<compile_context>
chip_gen: v7x
topology: tpu7x:2x2x1
jax: 0.10.0
libtpu: 0.0.40
codegen_flags: <defaults>
</compile_context>

<pallas_src>
import jax
import jax.numpy as jnp
import numpy as np
from jax.experimental import pallas as pl
from jax.experimental.pallas import tpu as pltpu

# ---- module hyper-parameters -------------------------------------------------
FILTER_SIZING = 2            # filter_sizing
DEPTH_MULT = 7               # D
RECEPTIVE_FIELD = 2          # temporal kernel width
CHANNEL_AMOUNT = 6           # spatial kernel width (== Conv2d in_channels)
SEP_KERNEL = 16              # separable depthwise kernel width
POOL = 5
BN_EPS = 1e-5

BATCH = 16                   # total samples in the demo (padded up to BLOCK_BATCH)
BLOCK_BATCH = 128            # samples per grid step (fills MXU rows; demo -> grid=(1,))
WIDTH = 30
F = FILTER_SIZING
C = FILTER_SIZING * DEPTH_MULT            # 14

W_VALID = WIDTH - CHANNEL_AMOUNT + 1      # 25   (spatial conv, valid)
W_POOL1 = W_VALID // POOL                 # 5    (after avgpool1)
K_FUSED = CHANNEL_AMOUNT + RECEPTIVE_FIELD - 1   # 7 taps of the fused temporal+spatial conv
IN_ROWS = CHANNEL_AMOUNT * WIDTH + 1      # 181  (flattened sample + ones column)
S_COLS = C * W_VALID + 1                  # 351
P_COLS = C * W_POOL1 + 1                  # 71

# lane-multiple padded sizes (zeros are inert end-to-end)
IN_ROWS_PAD = 256
S_COLS_PAD = 384
P_COLS_PAD = 128


def _elu(x):
    return jnp.where(x > 0, x, jnp.exp(jnp.minimum(x, 0.0)) - 1.0)


# ---- the kernel: 2 matmuls + 2 ELUs + a VPU projection per batch block --------
def eegnet_kernel(x_ref, a_ref, pc_ref, f_ref, out_ref):
    f32 = jnp.float32
    h = x_ref[...]                                                   # (Bblk, 256) incl. ones col
    # temporal('same') + BN1 + grouped spatial(valid) + BN2, fused; ELU (f32).
    s = _elu(jnp.dot(h.astype(a_ref.dtype), a_ref[...],
                     preferred_element_type=f32))                    # (Bblk, 384)
    # avgpool1 + separable depthwise[1,16]'same' + pointwise 1x1 + BN3, fused; ELU.
    # TODO(synk): nn.Dropout is identity in eval mode; stochastic training mask not implemented.
    q = _elu(jnp.dot(s.astype(pc_ref.dtype), pc_ref[...],
                     preferred_element_type=f32))                    # (Bblk, 128)
    # avgpool2 + flatten + fc2: tiny projection -> VPU multiply + XLU lane-reduce
    # (keeps the MXU free of a degenerate M=1 pass).
    out_ref[...] = jnp.sum(q * f_ref[...], axis=-1, keepdims=True)   # (Bblk, 1)


# ---- wrapper -----------------------------------------------------------------
def eegnet_forward(x, mats, *, block_batch=BLOCK_BATCH):
    n, cin, h, w = x.shape
    assert cin == CHANNEL_AMOUNT and h == 1 and w == WIDTH
    assert ((w - CHANNEL_AMOUNT + 1) // POOL) // POOL == 1, "endsize must be 14"
    assert block_batch % 8 == 0
    a_t, pc_t, f_row = mats

    g = int(pl.cdiv(n, block_batch))
    npad = g * block_batch

    # (npad, 256): flattened sample (180) + ones column (bias carrier) + zero lane padding.
    x3 = x[:, :, 0, :].reshape(n, cin * w).astype(jnp.float32)
    feat = jnp.zeros((npad, IN_ROWS_PAD), jnp.float32)
    feat = feat.at[:n, :cin * w].set(x3)
    feat = feat.at[:, cin * w].set(1.0)

    out = pl.pallas_call(
        eegnet_kernel,
        out_shape=jax.ShapeDtypeStruct((npad, 1), jnp.float32),
        grid=(g,),
        in_specs=[
            pl.BlockSpec((block_batch, IN_ROWS_PAD), lambda i: (i, 0)),  # batch block
            pl.BlockSpec(a_t.shape, lambda i: (0, 0)),    # fused temporal+spatial (+BN1/BN2)
            pl.BlockSpec(pc_t.shape, lambda i: (0, 0)),   # fused avgpool1+separable (+BN3)
            pl.BlockSpec(f_row.shape, lambda i: (0, 0)),  # avgpool2 + flatten + fc2
        ],
        out_specs=pl.BlockSpec((block_batch, 1), lambda i: (i, 0)),
        compiler_params=pltpu.CompilerParams(dimension_semantics=("parallel",)),
    )(feat, a_t, pc_t, f_row)
    return out[:n]


# ---- wrapper-side folding of the whole eval-mode network ----------------------
def build_kernel_matrices(p, *, use_bf16=False):
    """Fold convs, eval-mode BN, pools, flatten and fc2 into 3 dense matrices.

    All folding is done in float64; `use_bf16=True` casts the two matmul weight
    matrices to bf16 (v6e/v7x MXU-native).  The final projection row stays f32
    since it is applied on the VPU (v5e has no bf16 VPU path).
    """
    wt = np.asarray(p["wt"], np.float64)[:, :, 0, :]      # (F, 6, R)   temporal
    ws = np.asarray(p["ws"], np.float64)[:, 0, 0, :]      # (C, 6)      grouped spatial
    wd = np.asarray(p["wd"], np.float64)[:, 0, 0, :]      # (C, 16)     depthwise
    wp = np.asarray(p["wp"], np.float64)[:, :, 0, 0]      # (C, C)      pointwise
    fcw = np.asarray(p["fcw"], np.float64)                # (1, 14)
    fcb = float(np.asarray(p["fcb"])[0])

    def bn_affine(bn):
        gam, bet, mean, var = (np.asarray(t, np.float64) for t in bn)
        a = gam / np.sqrt(var + BN_EPS)
        return a, bet - a * mean

    A1, B1 = bn_affine(p["bn1"])                          # (F,)
    A2, B2 = bn_affine(p["bn2"])                          # (C,)
    A3, B3 = bn_affine(p["bn3"])                          # (C,)

    Cin, W, Wv, Wp = CHANNEL_AMOUNT, WIDTH, W_VALID, W_POOL1
    grp = np.arange(C) // DEPTH_MULT                      # output channel -> group

    # --- stage A: temporal('same', k=2, right pad 1) + BN1 -> spatial(grouped, k=6, valid) + BN2
    WC = np.zeros((C, Cin, K_FUSED), np.float64)          # fused tap weights
    for o in range(C):
        gidx = grp[o]
        for k in range(CHANNEL_AMOUNT):
            for r in range(RECEPTIVE_FIELD):
                WC[o, :, k + r] += A2[o] * A1[gidx] * ws[o, k] * wt[gidx, :, r]
    bias_a = A2 * (B1[grp] * ws.sum(axis=1)) + B2         # (C,)

    MA = np.zeros((C * Wv, Cin * W), np.float64)
    jv = np.arange(Wv)
    for o in range(C):
        for c in range(Cin):
            for m in range(K_FUSED):
                w = jv + m
                ok = w < W                                # w == W hits the 'same' zero pad
                MA[o * Wv + jv[ok], c * W + w[ok]] += WC[o, c, m]
    A1m = np.zeros((S_COLS, IN_ROWS), np.float64)
    A1m[:C * Wv, :Cin * W] = MA
    A1m[:C * Wv, Cin * W] = np.repeat(bias_a, Wv)
    A1m[C * Wv, Cin * W] = 1.0                            # keep ones column alive (ELU(1)=1)

    # --- avgpool1 [1,5] / [1,5]
    P1 = np.zeros((P_COLS, S_COLS), np.float64)
    for o in range(C):
        for q in range(Wp):
            P1[o * Wp + q, o * Wv + q * POOL: o * Wv + q * POOL + POOL] = 1.0 / POOL
    P1[C * Wp, C * Wv] = 1.0

    # --- separable: depthwise([1,16], 'same', pad 7/8) -> pointwise 1x1 -> BN3, fused.
    #     Only taps 3..11 appear (dead taps eliminated by construction).
    MC = np.zeros((P_COLS, P_COLS), np.float64)
    jo, ji = np.meshgrid(np.arange(Wp), np.arange(Wp), indexing="ij")
    tap = ji - jo + (SEP_KERNEL - 1) // 2                 # in [3, 11]
    for o in range(C):
        for c in range(C):
            MC[o * Wp:(o + 1) * Wp, c * Wp:(c + 1) * Wp] = A3[o] * wp[o, c] * wd[c, tap]
    MC[:C * Wp, C * Wp] = np.repeat(B3, Wp)
    MC[C * Wp, C * Wp] = 1.0

    # --- fold avgpool1 into the separable stage (no nonlinearity between them)
    PC = MC @ P1                                          # (71, 351); ones column survives

    # --- avgpool2 (5 -> 1) + flatten + fc2, fused
    F1 = np.zeros((1, P_COLS), np.float64)
    for o in range(C):
        F1[0, o * Wp:(o + 1) * Wp] = fcw[0, o] / POOL
    F1[0, C * Wp] = fcb

    # Kernel computes x @ M (batch on sublanes): transpose and zero-pad to lane multiples.
    a_t = np.zeros((IN_ROWS_PAD, S_COLS_PAD), np.float64)
    a_t[:IN_ROWS, :S_COLS] = A1m.T
    pc_t = np.zeros((S_COLS_PAD, P_COLS_PAD), np.float64)
    pc_t[:S_COLS, :P_COLS] = PC.T
    f_pad = np.zeros((1, P_COLS_PAD), np.float64)
    f_pad[0, :P_COLS] = F1[0]

    wdt = jnp.bfloat16 if use_bf16 else jnp.float32
    return (jnp.asarray(a_t, wdt), jnp.asarray(pc_t, wdt),
            jnp.asarray(f_pad, jnp.float32))


# ---- deterministic parameter init (PyTorch-shaped) ----------------------------
def init_params(key):
    ks = jax.random.split(key, 9)
    p = {
        "wt": 0.3 * jax.random.normal(ks[0], (F, 6, 1, RECEPTIVE_FIELD), jnp.float32),
        "ws": 0.3 * jax.random.normal(ks[1], (C, 1, 1, CHANNEL_AMOUNT), jnp.float32),
        "wd": 0.3 * jax.random.normal(ks[2], (C, 1, 1, SEP_KERNEL), jnp.float32),
        "wp": 0.3 * jax.random.normal(ks[3], (C, C, 1, 1), jnp.float32),
        "fcw": 0.3 * jax.random.normal(ks[4], (1, 14), jnp.float32),
        "fcb": 0.1 * jax.random.normal(ks[5], (1,), jnp.float32),
    }

    def bn_params(k, c):
        k1, k2, k3, k4 = jax.random.split(k, 4)
        gamma = 1.0 + 0.1 * jax.random.normal(k1, (c,), jnp.float32)
        beta = 0.1 * jax.random.normal(k2, (c,), jnp.float32)
        mean = 0.1 * jax.random.normal(k3, (c,), jnp.float32)
        var = 0.5 + jax.random.uniform(k4, (c,), jnp.float32)
        return gamma, beta, mean, var

    p["bn1"] = bn_params(ks[6], F)
    p["bn2"] = bn_params(ks[7], C)
    p["bn3"] = bn_params(ks[8], C)
    return p


# ---- pure-JAX NCHW reference (mirrors the PyTorch module, eval mode) ----------
def reference_forward(x, p):
    def bn(y, bp):
        g, b, m, v = bp
        sh = (1, -1, 1, 1)
        return (y - m.reshape(sh)) * jax.lax.rsqrt(v.reshape(sh) + BN_EPS) * g.reshape(sh) + b.reshape(sh)

    def elu(y):
        return jnp.where(y > 0, y, jnp.exp(jnp.minimum(y, 0.0)) - 1.0)

    N, _, H, W = x.shape
    xp = jnp.pad(x, ((0, 0), (0, 0), (0, 0), (0, 1)))            # 'same', k=2 -> pad right 1
    t = jnp.zeros((N, F, H, W), jnp.float32)
    for k in range(RECEPTIVE_FIELD):
        t = t + jnp.einsum("fc,nchw->nfhw", p["wt"][:, :, 0, k], xp[:, :, :, k:k + W])
    t = bn(t, p["bn1"])

    Wv = W - CHANNEL_AMOUNT + 1
    s = jnp.zeros((N, C, H, Wv), jnp.float32)
    for k in range(CHANNEL_AMOUNT):
        xk = jnp.repeat(t[:, :, :, k:k + Wv], DEPTH_MULT, axis=1)
        s = s + xk * p["ws"][:, 0, 0, k].reshape(1, -1, 1, 1)
    s = elu(bn(s, p["bn2"]))

    Wp1 = Wv // POOL
    p1 = s[:, :, :, :Wp1 * POOL].reshape(N, C, H, Wp1, POOL).mean(axis=-1)

    dpad = jnp.pad(p1, ((0, 0), (0, 0), (0, 0), (7, 8)))          # 'same', k=16
    dw = jnp.zeros_like(p1)
    for k in range(SEP_KERNEL):
        dw = dw + dpad[:, :, :, k:k + Wp1] * p["wd"][:, 0, 0, k].reshape(1, -1, 1, 1)
    pw = jnp.einsum("oc,nchw->nohw", p["wp"][:, :, 0, 0], dw)
    pw = elu(bn(pw, p["bn3"]))

    Wp2 = Wp1 // POOL
    p2 = pw[:, :, :, :Wp2 * POOL].reshape(N, C, H, Wp2, POOL).mean(axis=-1)
    flat = p2.reshape(N, -1)
    return flat @ p["fcw"].T + p["fcb"][None, :]


if __name__ == "__main__":
    key = jax.random.PRNGKey(0)
    pkey, xkey = jax.random.split(key)
    params = init_params(pkey)
    x = jax.random.normal(xkey, (BATCH, CHANNEL_AMOUNT, 1, WIDTH), jnp.float32)

    mats = build_kernel_matrices(params, use_bf16=False)  # f32 holds the 2e-3 tolerance
    out = jax.block_until_ready(eegnet_forward(x, mats, block_batch=BLOCK_BATCH))
    ref = reference_forward(x, params)

    assert out.shape == (BATCH, 1), out.shape
    if not jnp.allclose(out, ref, atol=2e-3, rtol=2e-3):
        raise AssertionError(f"Pallas output mismatch:\n{out}\nvs\n{ref}")
    print("KERNEL_OK")
</pallas_src>

<mosaic_0001>
module attributes {stable_mosaic.version = 11 : i64} {
  func.func @eegnet_kernel(%arg0: i32, %arg1: memref<128x256xf32, #tpu.memory_space<vmem>>, %arg2: memref<256x384xf32, #tpu.memory_space<vmem>>, %arg3: memref<384x128xf32, #tpu.memory_space<vmem>>, %arg4: memref<1x128xf32, #tpu.memory_space<vmem>>, %arg5: memref<128x1xf32, #tpu.memory_space<vmem>>) attributes {dimension_semantics = [#tpu.dimension_semantics<parallel>], iteration_bounds = array<i64: 1>, scalar_prefetch = 0 : i64, scratch_operands = 0 : i64, tpu.core_type = #tpu.core_type<tc>, window_params = [{transform_indices = @transform_0, window_bounds = array<i64: 128, 256>}, {pipeline_mode = #tpu.pipeline_mode<synchronous>, transform_indices = @transform_1, window_bounds = array<i64: 256, 384>}, {pipeline_mode = #tpu.pipeline_mode<synchronous>, transform_indices = @transform_2, window_bounds = array<i64: 384, 128>}, {pipeline_mode = #tpu.pipeline_mode<synchronous>, transform_indices = @transform_3, window_bounds = array<i64: 1, 128>}, {transform_indices = @transform_4, window_bounds = array<i64: 128, 1>}]} {
    %c0 = arith.constant 0 : index
    %c0_0 = arith.constant 0 : index
    %0 = vector.load %arg1[%c0, %c0_0] : memref<128x256xf32, #tpu.memory_space<vmem>>, vector<128x256xf32>
    %c0_1 = arith.constant 0 : index
    %c0_2 = arith.constant 0 : index
    %1 = vector.load %arg2[%c0_1, %c0_2] : memref<256x384xf32, #tpu.memory_space<vmem>>, vector<256x384xf32>
    %cst = arith.constant dense<0.000000e+00> : vector<128x384xf32>
    %2 = tpu.matmul %0, %1, %cst {dimension_numbers = #tpu.dot_dimension_numbers<[1], [0], [0], [1], [0, 0, 1, 1], [], []>} : vector<128x256xf32>, vector<256x384xf32>, vector<128x384xf32> -> vector<128x384xf32>
    %cst_3 = arith.constant 0.000000e+00 : f32
    %3 = vector.broadcast %cst_3 : f32 to vector<128x384xf32>
    %4 = arith.cmpf ogt, %2, %3 : vector<128x384xf32>
    %cst_4 = arith.constant 0.000000e+00 : f32
    %5 = vector.broadcast %cst_4 : f32 to vector<128x384xf32>
    %6 = arith.minimumf %2, %5 : vector<128x384xf32>
    %7 = math.exp %6 : vector<128x384xf32>
    %cst_5 = arith.constant 1.000000e+00 : f32
    %8 = vector.broadcast %cst_5 : f32 to vector<128x384xf32>
    %9 = arith.subf %7, %8 : vector<128x384xf32>
    %10 = arith.select %4, %2, %9 : vector<128x384xi1>, vector<128x384xf32>
    %c0_6 = arith.constant 0 : index
    %c0_7 = arith.constant 0 : index
    %11 = vector.load %arg3[%c0_6, %c0_7] : memref<384x128xf32, #tpu.memory_space<vmem>>, vector<384x128xf32>
    %cst_8 = arith.constant dense<0.000000e+00> : vector<128x128xf32>
    %12 = tpu.matmul %10, %11, %cst_8 {dimension_numbers = #tpu.dot_dimension_numbers<[1], [0], [0], [1], [0, 0, 1, 1], [], []>} : vector<128x384xf32>, vector<384x128xf32>, vector<128x128xf32> -> vector<128x128xf32>
    %cst_9 = arith.constant 0.000000e+00 : f32
    %13 = vector.broadcast %cst_9 : f32 to vector<128x128xf32>
    %14 = arith.cmpf ogt, %12, %13 : vector<128x128xf32>
    %cst_10 = arith.constant 0.000000e+00 : f32
    %15 = vector.broadcast %cst_10 : f32 to vector<128x128xf32>
    %16 = arith.minimumf %12, %15 : vector<128x128xf32>
    %17 = math.exp %16 : vector<128x128xf32>
    %cst_11 = arith.constant 1.000000e+00 : f32
    %18 = vector.broadcast %cst_11 : f32 to vector<128x128xf32>
    %19 = arith.subf %17, %18 : vector<128x128xf32>
    %20 = arith.select %14, %12, %19 : vector<128x128xi1>, vector<128x128xf32>
    %c0_12 = arith.constant 0 : index
    %c0_13 = arith.constant 0 : index
    %21 = vector.load %arg4[%c0_12, %c0_13] : memref<1x128xf32, #tpu.memory_space<vmem>>, vector<1x128xf32>
    %22 = vector.broadcast %21 : vector<1x128xf32> to vector<128x128xf32>
    %23 = arith.mulf %20, %22 : vector<128x128xf32>
    %cst_14 = arith.constant dense<0.000000e+00> : vector<128xf32>
    %24 = vector.multi_reduction <add>, %23, %cst_14 [1] : vector<128x128xf32> to vector<128xf32>
    %25 = vector.shape_cast %24 : vector<128xf32> to vector<128x1xf32>
    %c0_15 = arith.constant 0 : index
    %c0_16 = arith.constant 0 : index
    %26 = vector.load %arg5[%c0_15, %c0_16] : memref<128x1xf32, #tpu.memory_space<vmem>>, vector<128x1xf32>
    tpu.vector_store %arg5[%c0_15, %c0_16], %25 {strides = array<i32>} : memref<128x1xf32, #tpu.memory_space<vmem>>, vector<128x1xf32>,
    return
  }
  func.func @transform_0(%arg0: i32) -> (i32, i32) {
    %c0_i32 = arith.constant 0 : i32
    %c0_i32_0 = arith.constant 0 : i32
    return %arg0, %c0_i32 : i32, i32
  }
  func.func @transform_1(%arg0: i32) -> (i32, i32) {
    %c0_i32 = arith.constant 0 : i32
    %c0_i32_0 = arith.constant 0 : i32
    %c0_i32_1 = arith.constant 0 : i32
    return %c0_i32, %c0_i32_0 : i32, i32
  }
  func.func @transform_2(%arg0: i32) -> (i32, i32) {
    %c0_i32 = arith.constant 0 : i32
    %c0_i32_0 = arith.constant 0 : i32
    %c0_i32_1 = arith.constant 0 : i32
    return %c0_i32, %c0_i32_0 : i32, i32
  }
  func.func @transform_3(%arg0: i32) -> (i32, i32) {
    %c0_i32 = arith.constant 0 : i32
    %c0_i32_0 = arith.constant 0 : i32
    %c0_i32_1 = arith.constant 0 : i32
    return %c0_i32, %c0_i32_0 : i32, i32
  }
  func.func @transform_4(%arg0: i32) -> (i32, i32) {
    %c0_i32 = arith.constant 0 : i32
    %c0_i32_0 = arith.constant 0 : i32
    return %arg0, %c0_i32 : i32, i32
  }
}

</mosaic_0001>

<bundles_post_ra>
// kernel: tpu_custom_call.1
= control target key start
LH: loop header
LB: loop body
LE: loop exit
PB: predicated region body
PF: predicated region fallthrough
CT: control target
= control target key end

     0   :  { %9 = vsyncpa [#allocation3], 0  ;;  %s2444_s0 = inlined_call_operand.hbm [shape: f32[128,256], index: 0, kind: input, shape index: {}]   ;;  %s2445_s1 = inlined_call_operand.hbm [shape: f32[256,384], index: 1, kind: input, shape index: {}]   ;;  %s2446_s2 = inlined_call_operand.hbm [shape: f32[384,128], index: 2, kind: input, shape index: {}]   ;;  %s2447_s3 = inlined_call_operand.vmem [shape: f32[1,128], index: 3, kind: input, shape index: {}]   ;;  %s2448_s4 = inlined_call_operand.vmem [shape: f32[128,1], index: 4, kind: output, shape index: {}]  }
   0x1   :  { %10 = vsyncpa [#allocation5], 0  ;;  %s1972_s15 = smov [#allocation4]   ;;  %s1902_s19 = scalar_lea.hbm %s2445_s1, 12288 }
   0x2   :  { %s28_s16 = sshll.u32 %s1972_s15, 4  ;;  %p1903_p0 = scmp.ne.s32.totalorder %s2445_s1, %s1902_s19  ;;  %s29_s16 = int_to_ptr.vmem [resolvable:$true] %s28_s16 }
   0x3   :  { %p1906_p1 = scmp.lt.u32.totalorder %s1902_s19, %s2445_s1 }
   0x5   :  { %p1908_p2 = pnand %p1906_p1, %p1903_p0 }
   0x7   :  { %1911 = shalt.err (!%p1908_p2)
}
   0x8   :  { %s1912_s24 = scalar_lea.vmem %s29_s16, 12288  ;;  %p1917_p4 = scmp.lt.s32.totalorder %s29_s16, %s29_s16 }
   0x9   :  { %p1913_p3 = scmp.ne.s32.totalorder %s29_s16, %s1912_s24  ;;  %p1918_p5 = scmp.lt.s32.totalorder %s1912_s24, %s1912_s24 }
   0xb   :  { %p1919_p6 = por %p1918_p5, %p1917_p4 }
   0xd   :  { %p1920_p7 = pnand %p1919_p6, %p1913_p3 }
   0xf   :  { %1923 = shalt.err (!%p1920_p7)
}
  0x10   :  { %s1973_s25 = smov 384   ;;  %s1974_s26 = smov 24  }
  0x11   :  { %34 = dma.hbm_to_vmem [thread:$0]  %s2445_s1, 12288, %s29_s16, [#allocation5], %s1973_s25, %s1973_s25, %s1974_s26  }
  0x12   :  { %s1975_s29 = smov [#allocation2]   ;;  %s1924_s7 = scalar_lea.hbm %s2444_s0, 4096 }
  0x13   :  { %s16_s30 = sshll.u32 %s1975_s29, 4  ;;  %p1925_p8 = scmp.ne.s32.totalorder %s2444_s0, %s1924_s7  ;;  %s17_s30 = int_to_ptr.vmem [resolvable:$true] %s16_s30 }
  0x14   :  { %p1928_p9 = scmp.lt.u32.totalorder %s1924_s7, %s2444_s0 }
  0x16   :  { %p1930_p10 = pnand %p1928_p9, %p1925_p8 }
  0x18   :  { %1933 = shalt.err (!%p1930_p10)
}
  0x19   :  { %s1934_s12 = scalar_lea.vmem %s17_s30, 4096  ;;  %p1939_p12 = scmp.lt.s32.totalorder %s17_s30, %s17_s30 }
  0x1a   :  { %p1935_p11 = scmp.ne.s32.totalorder %s17_s30, %s1934_s12  ;;  %p1940_p13 = scmp.lt.s32.totalorder %s1934_s12, %s1934_s12 }
  0x1c   :  { %p1941_p0 = por %p1940_p13, %p1939_p12 }
  0x1e   :  { %p1942_p1 = pnand %p1941_p0, %p1935_p11 }
  0x20   :  { %1945 = shalt.err (!%p1942_p1)
}
  0x21   :  { %s1976_s1 = smov 256   ;;  %s1977_s13 = smov 16  }
  0x22   :  { %22 = dma.hbm_to_vmem [thread:$0]  %s2444_s0, 4096, %s17_s30, [#allocation3], %s1976_s1, %s1976_s1, %s1977_s13  }
  0x23   :  { %s1978_s16 = smov [#allocation6]   ;;  %s1946_s20 = scalar_lea.hbm %s2446_s2, 6144 }
  0x24   :  { %s40_s17 = sshll.u32 %s1978_s16, 4  ;;  %p1947_p2 = scmp.ne.s32.totalorder %s2446_s2, %s1946_s20  ;;  %s41_s17 = int_to_ptr.vmem [resolvable:$true] %s40_s17 }
  0x25   :  { %p1950_p3 = scmp.lt.u32.totalorder %s1946_s20, %s2446_s2 }
  0x27   :  { %p1952_p4 = pnand %p1950_p3, %p1947_p2 }
  0x29   :  { %1955 = shalt.err (!%p1952_p4)
}
  0x2a   :  { %s1956_s25 = scalar_lea.vmem %s41_s17, 6144  ;;  %p1961_p6 = scmp.lt.s32.totalorder %s41_s17, %s41_s17 }
  0x2b   :  { %p1957_p5 = scmp.ne.s32.totalorder %s41_s17, %s1956_s25  ;;  %p1962_p7 = scmp.lt.s32.totalorder %s1956_s25, %s1956_s25 }
  0x2d   :  { %p1963_p8 = por %p1962_p7, %p1961_p6 }
  0x2f   :  { %p1964_p9 = pnand %p1963_p8, %p1957_p5 }
  0x31   :  { %1967 = shalt.err (!%p1964_p9)
}
  0x32   :  { %s1979_s0 = smov 128   ;;  %s1980_s26 = smov 8  }
  0x33   :  { %46 = dma.hbm_to_vmem [thread:$0]  %s2446_s2, 6144, %s41_s17, [#allocation5], %s1979_s0, %s1979_s0, %s1980_s26  }
  0x34   :  { %1968 = dma.done.wait [#allocation3], 4096  }
  0x35   :  { %1969 = vsyncadd [#allocation3], 4294963200 }
  0x36   :  { %1970 = dma.done.wait [#allocation5], 18432  }
  0x37   :  { %1971 = vsyncadd [#allocation5], 4294948864  ;;  %v91_v0 = vld [vmem:[#allocation4 + $0x8] sm:$0xff]  ;;  %v94_v1 = vld [vmem:[#allocation4 + $0x20] sm:$0xff] }
  0x38   :  { %v90_v2 = vld [vmem:[#allocation4] sm:$0xff]  ;;  %v1605_v3 = vpack.c.bf16 %v94_v1, %v91_v0  ;;  %v93_v4 = vld [vmem:[#allocation4 + $0x18] sm:$0xff]  ;;  %v100_v6 = vld [vmem:[#allocation4 + $0x50] sm:$0xff] }
  0x39   :  { %v97_v5 = vld [vmem:[#allocation4 + $0x38] sm:$0xff]  ;;  %v1607_v7 = vpack.c.bf16 %v93_v4, %v90_v2  ;;  %v96_v9 = vld [vmem:[#allocation4 + $0x30] sm:$0xff]  ;;  %v99_v10 = vld [vmem:[#allocation4 + $0x48] sm:$0xff] }
  0x3a   :  { %v1609_v8 = vpack.c.bf16 %v100_v6, %v97_v5  ;;  %v103_v11 = vld [vmem:[#allocation4 + $0x68] sm:$0xff]  ;;  %1606 = vmatprep.subr.bf16.mxu0 %v1605_v3  ;;  %v106_v12 = vld [vmem:[#allocation4 + $0x80] sm:$0xff]  ;;  %v1611_v13 = vpack.c.bf16 %v99_v10, %v96_v9  ;;  %v105_v15 = vld [vmem:[#allocation4 + $0x78] sm:$0xff] }
  0x3b   :  { %1608 = vmatpush1.bf16.msra.mxu0 %v1607_v7  ;;  %v102_v14 = vld [vmem:[#allocation4 + $0x60] sm:$0xff]  ;;  %v1613_v16 = vpack.c.bf16 %v106_v12, %v103_v11  ;;  %v109_v17 = vld [vmem:[#allocation4 + $0x98] sm:$0xff]  ;;  %v140_v18 = vld [vmem:[#allocation4 + $0x190] sm:$0xff] }
  0x3c   :  { %1610 = vmatprep.subr.bf16.mxu0 %v1609_v8  ;;  %v143_v19 = vld [vmem:[#allocation4 + $0x1a8] sm:$0xff]  ;;  %v112_v20 = vld [vmem:[#allocation4 + $0xb0] sm:$0xff]  ;;  %v1615_v25 = vpack.c.bf16 %v105_v15, %v102_v14  ;;  %v146_v26 = vld [vmem:[#allocation4 + $0x1c0] sm:$0xff] }
  0x3d   :  { %v1669_v21 = vpack.c.bf16 %v143_v19, %v140_v18  ;;  %v92_v22 = vld [vmem:[#allocation4 + $0x10] sm:$0xff]  ;;  %v95_v23 = vld [vmem:[#allocation4 + $0x28] sm:$0xff]  ;;  %v149_v27 = vld [vmem:[#allocation4 + $0x1d8] sm:$0xff]  ;;  %v1617_v29 = vpack.c.bf16 %v112_v20, %v109_v17 }
  0x3e   :  { %v1671_v24 = vpack.c.bf16 %v95_v23, %v92_v22  ;;  %v98_v28 = vld [vmem:[#allocation4 + $0x40] sm:$0xff]  ;;  %v108_v30 = vld [vmem:[#allocation4 + $0x90] sm:$0xff]  ;;  %v111_v31 = vld [vmem:[#allocation4 + $0xa8] sm:$0xff]  ;;  %v1673_v32 = vpack.c.bf16 %v149_v27, %v146_v26 }
  0x3f   :  { %1612 = vmatpush1.bf16.msra.mxu0 %v1611_v13  ;;  %1670 = vmatprep.subr.bf16.mxu1 %v1669_v21  ;;  %v101_v33 = vld [vmem:[#allocation4 + $0x58] sm:$0xff]  ;;  %v115_v34 = vld [vmem:[#allocation4 + $0xc8] sm:$0xff]  ;;  %v118_v35 = vld [vmem:[#allocation4 + $0xe0] sm:$0xff]  ;;  %v1619_v41 = vpack.c.bf16 %v111_v31, %v108_v30 }
  0x40   :  { %1614 = vmatprep.subr.bf16.mxu0 %v1613_v16  ;;  %1672 = vmatpush3.bf16.msra.mxu1 %v1671_v24  ;;  %v1675_v36 = vpack.c.bf16 %v101_v33, %v98_v28  ;;  %v152_v37 = vld [vmem:[#allocation4 + $0x1f0] sm:$0xff]  ;;  %v155_v38 = vld [vmem:[#allocation4 + $0x208] sm:$0xff]  ;;  %v114_v42 = vld [vmem:[#allocation4 + $0xc0] sm:$0xff]  ;;  %v1621_v45 = vpack.c.bf16 %v118_v35, %v115_v34 }
  0x41   :  { %1674 = vmatprep.subr.bf16.mxu1 %v1673_v32  ;;  %v104_v39 = vld [vmem:[#allocation4 + $0x70] sm:$0xff]  ;;  %v107_v40 = vld [vmem:[#allocation4 + $0x88] sm:$0xff]  ;;  %v117_v43 = vld [vmem:[#allocation4 + $0xd8] sm:$0xff]  ;;  %v1677_v44 = vpack.c.bf16 %v155_v38, %v152_v37 }
  0x42   :  { %v121_v46 = vld [vmem:[#allocation4 + $0xf8] sm:$0xff]  ;;  %v1679_v47 = vpack.c.bf16 %v107_v40, %v104_v39  ;;  %v158_v48 = vld [vmem:[#allocation4 + $0x220] sm:$0xff]  ;;  %v124_v50 = vld [vmem:[#allocation4 + $0x110] sm:$0xff]  ;;  %v1623_v54 = vpack.c.bf16 %v117_v43, %v114_v42 }
  0x43   :  { %1616 = vmatpush1.bf16.msra.mxu0 %v1615_v25  ;;  %v161_v49 = vld [vmem:[#allocation4 + $0x238] sm:$0xff]  ;;  %v110_v52 = vld [vmem:[#allocation4 + $0xa0] sm:$0xff]  ;;  %v164_v55 = vld [vmem:[#allocation4 + $0x250] sm:$0xff]  ;;  %v1625_v57 = vpack.c.bf16 %v124_v50, %v121_v46 }
  0x44   :  { %1618 = vmatprep.subr.bf16.mxu0 %v1617_v29  ;;  %1676 = vmatpush3.bf16.msra.mxu1 %v1675_v36  ;;  %v1681_v51 = vpack.c.bf16 %v161_v49, %v158_v48  ;;  %v113_v53 = vld [vmem:[#allocation4 + $0xb8] sm:$0xff]  ;;  %v167_v56 = vld [vmem:[#allocation4 + $0x268] sm:$0xff]  ;;  %v120_v58 = vld [vmem:[#allocation4 + $0xf0] sm:$0xff] }
  0x45   :  { %1678 = vmatprep.subr.bf16.mxu1 %v1677_v44  ;;  %v123_v59 = vld [vmem:[#allocation4 + $0x108] sm:$0xff]  ;;  %v1683_v61 = vpack.c.bf16 %v113_v53, %v110_v52  ;;  %v130_v62 = vld [vmem:[#allocation4 + $0x140] sm:$0xff]  ;;  %v1685_v63 = vpack.c.bf16 %v167_v56, %v164_v55  ;;  %v116_v0 = vld [vmem:[#allocation4 + $0xd0] sm:$0xff] }
  0x46   :  { %v127_v60 = vld [vmem:[#allocation4 + $0x128] sm:$0xff]  ;;  %v170_v2 = vld [vmem:[#allocation4 + $0x280] sm:$0xff]  ;;  %v173_v3 = vld [vmem:[#allocation4 + $0x298] sm:$0xff]  ;;  %v1627_v4 = vpack.c.bf16 %v123_v59, %v120_v58 }
  0x47   :  { %1620 = vmatpush1.bf16.msra.mxu0 %v1619_v41  ;;  %v119_v1 = vld [vmem:[#allocation4 + $0xe8] sm:$0xff]  ;;  %v1629_v5 = vpack.c.bf16 %v130_v62, %v127_v60  ;;  %v126_v6 = vld [vmem:[#allocation4 + $0x120] sm:$0xff]  ;;  %v129_v7 = vld [vmem:[#allocation4 + $0x138] sm:$0xff]  ;;  %v1689_v11 = vpack.c.bf16 %v173_v3, %v170_v2 }
  0x48   :  { %1622 = vmatprep.subr.bf16.mxu0 %v1621_v45  ;;  %1680 = vmatpush3.bf16.msra.mxu1 %v1679_v47  ;;  %v133_v8 = vld [vmem:[#allocation4 + $0x158] sm:$0xff]  ;;  %v1687_v9 = vpack.c.bf16 %v119_v1, %v116_v0  ;;  %v136_v10 = vld [vmem:[#allocation4 + $0x170] sm:$0xff]  ;;  %v122_v12 = vld [vmem:[#allocation4 + $0x100] sm:$0xff]  ;;  %v1631_v16 = vpack.c.bf16 %v129_v7, %v126_v6 }
  0x49   :  { %1682 = vmatprep.subr.bf16.mxu1 %v1681_v51  ;;  %v125_v13 = vld [vmem:[#allocation4 + $0x118] sm:$0xff]  ;;  %v176_v14 = vld [vmem:[#allocation4 + $0x2b0] sm:$0xff]  ;;  %v179_v15 = vld [vmem:[#allocation4 + $0x2c8] sm:$0xff]  ;;  %v1633_v18 = vpack.c.bf16 %v136_v10, %v133_v8 }
  0x4a   :  { %v132_v17 = vld [vmem:[#allocation4 + $0x150] sm:$0xff]  ;;  %v135_v19 = vld [vmem:[#allocation4 + $0x168] sm:$0xff]  ;;  %v142_v21 = vld [vmem:[#allocation4 + $0x1a0] sm:$0xff]  ;;  %v1691_v22 = vpack.c.bf16 %v125_v13, %v122_v12  ;;  %v1693_v23 = vpack.c.bf16 %v179_v15, %v176_v14 }
  0x4b   :  { %1624 = vmatpush1.bf16.msra.mxu0 %v1623_v54  ;;  %v139_v20 = vld [vmem:[#allocation4 + $0x188] sm:$0xff]  ;;  %v128_v24 = vld [vmem:[#allocation4 + $0x130] sm:$0xff]  ;;  %v182_v27 = vld [vmem:[#allocation4 + $0x2e0] sm:$0xff]  ;;  %v1635_v29 = vpack.c.bf16 %v135_v19, %v132_v17 }
  0x4c   :  { %1626 = vmatprep.subr.bf16.mxu0 %v1625_v57  ;;  %1684 = vmatpush3.bf16.msra.mxu1 %v1683_v61  ;;  %v131_v25 = vld [vmem:[#allocation4 + $0x148] sm:$0xff]  ;;  %v185_v28 = vld [vmem:[#allocation4 + $0x2f8] sm:$0xff]  ;;  %v1637_v30 = vpack.c.bf16 %v142_v21, %v139_v20  ;;  %v138_v31 = vld [vmem:[#allocation4 + $0x180] sm:$0xff] }
  0x4d   :  { %1686 = vmatprep.subr.bf16.mxu1 %v1685_v63  ;;  %v59_v26 = vld [vmem:[#allocation2 + $0x8] sm:$0xff]  ;;  %v141_v32 = vld [vmem:[#allocation4 + $0x198] sm:$0xff]  ;;  %v1695_v34 = vpack.c.bf16 %v131_v25, %v128_v24  ;;  %v148_v35 = vld [vmem:[#allocation4 + $0x1d0] sm:$0xff]  ;;  %v1697_v36 = vpack.c.bf16 %v185_v28, %v182_v27 }
  0x4e   :  { %411 = vmatprep.mubr.f32.mxu1 %v59_v26  ;;  %250 = vmatprep.mubr.f32.mxu0 %v59_v26  ;;  %v145_v33 = vld [vmem:[#allocation4 + $0x1b8] sm:$0xff]  ;;  %v134_v37 = vld [vmem:[#allocation4 + $0x160] sm:$0xff]  ;;  %v1639_v39 = vpack.c.bf16 %v141_v32, %v138_v31  ;;  %v144_v41 = vld [vmem:[#allocation4 + $0x1b0] sm:$0xff] }
  0x4f   :  { %1628 = vmatpush1.bf16.msra.mxu0 %v1627_v4  ;;  %v137_v38 = vld [vmem:[#allocation4 + $0x178] sm:$0xff]  ;;  %v1641_v40 = vpack.c.bf16 %v148_v35, %v145_v33  ;;  %v147_v42 = vld [vmem:[#allocation4 + $0x1c8] sm:$0xff]  ;;  %v154_v45 = vld [vmem:[#allocation4 + $0x200] sm:$0xff] }
  0x50   :  { %1630 = vmatprep.subr.bf16.mxu0 %v1629_v5  ;;  %1688 = vmatpush3.bf16.msra.mxu1 %v1687_v9  ;;  %v1699_v43 = vpack.c.bf16 %v137_v38, %v134_v37  ;;  %v151_v44 = vld [vmem:[#allocation4 + $0x1e8] sm:$0xff]  ;;  %v1643_v46 = vpack.c.bf16 %v147_v42, %v144_v41  ;;  %v150_v48 = vld [vmem:[#allocation4 + $0x1e0] sm:$0xff]  ;;  %v153_v49 = vld [vmem:[#allocation4 + $0x1f8] sm:$0xff] }
  0x51   :  { %1690 = vmatprep.subr.bf16.mxu1 %v1689_v11  ;;  %v1645_v47 = vpack.c.bf16 %v154_v45, %v151_v44  ;;  %v2042_v50 = vld [vmem:[#allocation2] sm:$0xff]  ;;  %v157_v51 = vld [vmem:[#allocation4 + $0x218] sm:$0xff]  ;;  %v160_v52 = vld [vmem:[#allocation4 + $0x230] sm:$0xff]  ;;  %v1647_v54 = vpack.c.bf16 %v153_v49, %v150_v48 }
  0x52   :  { %v2044_v53 = vld [vmem:[#allocation2 + $0x18] sm:$0xff]  ;;  %v156_v55 = vld [vmem:[#allocation4 + $0x210] sm:$0xff]  ;;  %v1649_v56 = vpack.c.bf16 %v160_v52, %v157_v51  ;;  %v159_v57 = vld [vmem:[#allocation4 + $0x228] sm:$0xff] }
  0x53   :  { %1632 = vmatpush1.bf16.msra.mxu0 %v1631_v16  ;;  %v163_v58 = vld [vmem:[#allocation4 + $0x248] sm:$0xff]  ;;  %v2048_v59 = vld [vmem:[#allocation2 + $0x10] sm:$0xff]  ;;  %v166_v60 = vld [vmem:[#allocation4 + $0x260] sm:$0xff]  ;;  %v1651_v3 = vpack.c.bf16 %v159_v57, %v156_v55 }
  0x54   :  { %1634 = vmatprep.subr.bf16.mxu0 %v1633_v18  ;;  %1692 = vmatpush3.bf16.msra.mxu1 %v1691_v22  ;;  %v2050_v61 = vld [vmem:[#allocation2 + $0x28] sm:$0xff]  ;;  %v796_v62 = vld [vmem:[#allocation6 + $0x80] sm:$0xff]  ;;  %v798_v6 = vld [vmem:[#allocation6 + $0x90] sm:$0xff]  ;;  %v1653_v9 = vpack.c.bf16 %v166_v60, %v163_v58 }
  0x55   :  { %1694 = vmatprep.subr.bf16.mxu1 %v1693_v23  ;;  %v162_v63 = vld [vmem:[#allocation4 + $0x240] sm:$0xff]  ;;  %v797_v0 = vld [vmem:[#allocation6 + $0x88] sm:$0xff]  ;;  %v799_v7 = vld [vmem:[#allocation6 + $0x98] sm:$0xff] }
  0x56   :  { %v780_v1 = vld [vmem:[#allocation6] sm:$0xff]  ;;  %v781_v2 = vld [vmem:[#allocation6 + $0x8] sm:$0xff]  ;;  %v1701_v4 = vpack.c.bf16 %v797_v0, %v796_v62  ;;  %v782_v8 = vld [vmem:[#allocation6 + $0x10] sm:$0xff]  ;;  %v1705_v16 = vpack.c.bf16 %v799_v7, %v798_v6 }
  0x57   :  { %1636 = vmatpush1.bf16.msra.mxu0 %v1635_v29  ;;  %v1703_v5 = vpack.c.bf16 %v781_v2, %v780_v1  ;;  %v165_v10 = vld [vmem:[#allocation4 + $0x258] sm:$0xff]  ;;  %v2054_v11 = vld [vmem:[#allocation2 + $0x20] sm:$0xff]  ;;  %v172_v14 = vld [vmem:[#allocation4 + $0x290] sm:$0xff] }
  0x58   :  { %1638 = vmatprep.subr.bf16.mxu0 %v1637_v30  ;;  %1696 = vmatpush3.bf16.msra.mxu1 %v1695_v34  ;;  %v783_v12 = vld [vmem:[#allocation6 + $0x18] sm:$0xff]  ;;  %v800_v18 = vld [vmem:[#allocation6 + $0xa0] sm:$0xff]  ;;  %v801_v19 = vld [vmem:[#allocation6 + $0xa8] sm:$0xff]  ;;  %v1655_v20 = vpack.c.bf16 %v165_v10, %v162_v63 }
  0x59   :  { %1698 = vmatprep.subr.bf16.mxu1 %v1697_v36  ;;  %v169_v13 = vld [vmem:[#allocation4 + $0x278] sm:$0xff]  ;;  %v1707_v17 = vpack.c.bf16 %v783_v12, %v782_v8  ;;  %v784_v21 = vld [vmem:[#allocation6 + $0x20] sm:$0xff]  ;;  %v785_v22 = vld [vmem:[#allocation6 + $0x28] sm:$0xff]  ;;  %v1709_v30 = vpack.c.bf16 %v801_v19, %v800_v18 }
  0x5a   :  { %v2056_v15 = vld [vmem:[#allocation2 + $0x38] sm:$0xff]  ;;  %v1657_v23 = vpack.c.bf16 %v172_v14, %v169_v13  ;;  %v168_v24 = vld [vmem:[#allocation4 + $0x270] sm:$0xff]  ;;  %v171_v25 = vld [vmem:[#allocation4 + $0x288] sm:$0xff]  ;;  %v1711_v31 = vpack.c.bf16 %v785_v22, %v784_v21 }
  0x5b   :  { %1640 = vmatpush1.bf16.msra.mxu0 %v1639_v39  ;;  %v2060_v26 = vld [vmem:[#allocation2 + $0x30] sm:$0xff]  ;;  %v175_v27 = vld [vmem:[#allocation4 + $0x2a8] sm:$0xff]  ;;  %v178_v28 = vld [vmem:[#allocation4 + $0x2c0] sm:$0xff]  ;;  %v1659_v34 = vpack.c.bf16 %v171_v25, %v168_v24 }
  0x5c   :  { %1642 = vmatprep.subr.bf16.mxu0 %v1641_v40  ;;  %1700 = vmatpush3.bf16.msra.mxu1 %v1699_v43  ;;  %v2062_v29 = vld [vmem:[#allocation2 + $0x48] sm:$0xff]  ;;  %v802_v32 = vld [vmem:[#allocation6 + $0xb0] sm:$0xff]  ;;  %v803_v33 = vld [vmem:[#allocation6 + $0xb8] sm:$0xff]  ;;  %v1661_v37 = vpack.c.bf16 %v178_v28, %v175_v27 }
  0x5d   :  { %1702 = vmatprep.subr.bf16.mxu1 %v1701_v4  ;;  %v786_v35 = vld [vmem:[#allocation6 + $0x30] sm:$0xff]  ;;  %v787_v36 = vld [vmem:[#allocation6 + $0x38] sm:$0xff]  ;;  %v174_v38 = vld [vmem:[#allocation4 + $0x2a0] sm:$0xff]  ;;  %v1713_v44 = vpack.c.bf16 %v803_v33, %v802_v32 }
  0x5e   :  { %v177_v39 = vld [vmem:[#allocation4 + $0x2b8] sm:$0xff]  ;;  %v2066_v40 = vld [vmem:[#allocation2 + $0x40] sm:$0xff]  ;;  %v184_v42 = vld [vmem:[#allocation4 + $0x2f0] sm:$0xff]  ;;  %v1715_v45 = vpack.c.bf16 %v787_v36, %v786_v35 }
  0x5f   :  { %1644 = vmatpush1.bf16.msra.mxu0 %v1643_v46  ;;  %412 = vmatmul.mubr.f32.vlgmr.msra.gmra.mrb[0].mxu1 %v2042_v50  ;;  %v181_v41 = vld [vmem:[#allocation4 + $0x2d8] sm:$0xff]  ;;  %v1663_v46 = vpack.c.bf16 %v177_v39, %v174_v38  ;;  %v180_v48 = vld [vmem:[#allocation4 + $0x2d0] sm:$0xff]  ;;  %v183_v49 = vld [vmem:[#allocation4 + $0x2e8] sm:$0xff] }
  0x60   :  { %1646 = vmatprep.subr.bf16.mxu0 %v1645_v47  ;;  %416 = vmatprep.mubr.f32.mxu1 %v2044_v53  ;;  %v2068_v43 = vld [vmem:[#allocation2 + $0x58] sm:$0xff]  ;;  %v1665_v47 = vpack.c.bf16 %v184_v42, %v181_v41  ;;  %v68_v51 = vld [vmem:[#allocation2 + $0x50] sm:$0xff]  ;;  %v71_v52 = vld [vmem:[#allocation2 + $0x68] sm:$0xff] }
  0x61   :  { %1704 = vmatpush3.bf16.msra.mxu1 %v1703_v5  ;;  %v813_v55 = vld [vmem:[#allocation6 + $0x108] sm:$0xff]  ;;  %v70_v57 = vld [vmem:[#allocation2 + $0x60] sm:$0xff]  ;;  %v73_v60 = vld [vmem:[#allocation2 + $0x78] sm:$0xff] }
  0x62   :  { %1706 = vmatprep.subr.bf16.mxu1 %v1705_v16  ;;  %v814_v62 = vld [vmem:[#allocation6 + $0x110] sm:$0xff]  ;;  %v815_v63 = vld [vmem:[#allocation6 + $0x118] sm:$0xff]  ;;  %v75_v1 = vld [vmem:[#allocation2 + $0x88] sm:$0xff] }
  0x63   :  { %1648 = vmatpush1.bf16.msra.mxu0 %v1647_v54  ;;  %417 = vmatmul.mubr.f32.gmra.mrb[2].mxu1 %v2048_v59  ;;  %v812_v54 = vld [vmem:[#allocation6 + $0x100] sm:$0xff]  ;;  %v72_v0 = vld [vmem:[#allocation2 + $0x70] sm:$0xff]  ;;  %v1737_v2 = vpack.c.bf16 %v815_v63, %v814_v62  ;;  %v77_v4 = vld [vmem:[#allocation2 + $0x98] sm:$0xff] }
  0x64   :  { %1650 = vmatprep.subr.bf16.mxu0 %v1649_v56  ;;  %421 = vmatprep.mubr.f32.mxu1 %v2050_v61  ;;  %v1667_v56 = vpack.c.bf16 %v183_v49, %v180_v48  ;;  %v1733_v58 = vpack.c.bf16 %v813_v55, %v812_v54  ;;  %v76_v5 = vld [vmem:[#allocation2 + $0x90] sm:$0xff]  ;;  %v79_v6 = vld [vmem:[#allocation2 + $0xa8] sm:$0xff]  ;;  %v82_v7 = vld [vmem:[#allocation2 + $0xc0] sm:$0xff] }
  0x65   :  { %1708 = vmatpush3.bf16.msra.mxu1 %v1707_v17  ;;  %v85_v8 = vld [vmem:[#allocation2 + $0xd8] sm:$0xff]  ;;  %v87_v10 = vld [vmem:[#allocation2 + $0xe8] sm:$0xff]  ;;  %v88_v13 = vld [vmem:[#allocation2 + $0xf0] sm:$0xff] }
  0x66   :  { %1710 = vmatprep.subr.bf16.mxu1 %v1709_v30  ;;  %v89_v12 = vld [vmem:[#allocation2 + $0xf8] sm:$0xff]  ;;  %v816_v14 = vld [vmem:[#allocation6 + $0x120] sm:$0xff]  ;;  %v818_v17 = vld [vmem:[#allocation6 + $0x130] sm:$0xff] }
  0x67   :  { %1652 = vmatpush1.bf16.msra.mxu0 %v1651_v3  ;;  %422 = vmatmul.mubr.f32.gmra.mrb[4].mxu1 %v2054_v11  ;;  %v74_v3 = vld [vmem:[#allocation2 + $0x80] sm:$0xff]  ;;  %v819_v18 = vld [vmem:[#allocation6 + $0x138] sm:$0xff]  ;;  %v821_v21 = vld [vmem:[#allocation6 + $0x148] sm:$0xff] }
  0x68   :  { %1654 = vmatprep.subr.bf16.mxu0 %v1653_v9  ;;  %426 = vmatprep.mubr.f32.mxu1 %v2056_v15  ;;  %v84_v9 = vld [vmem:[#allocation2 + $0xd0] sm:$0xff]  ;;  %v1745_v19 = vpack.c.bf16 %v819_v18, %v818_v17  ;;  %v823_v24 = vld [vmem:[#allocation6 + $0x158] sm:$0xff]  ;;  %v825_v27 = vld [vmem:[#allocation6 + $0x168] sm:$0xff] }
  0x69   :  { %1712 = vmatpush3.bf16.msra.mxu1 %v1711_v31  ;;  %v804_v28 = vld [vmem:[#allocation6 + $0xc0] sm:$0xff]  ;;  %v789_v33 = vld [vmem:[#allocation6 + $0x48] sm:$0xff]  ;;  %v807_v35 = vld [vmem:[#allocation6 + $0xd8] sm:$0xff] }
  0x6a   :  { %1714 = vmatprep.subr.bf16.mxu1 %v1713_v44  ;;  %v788_v30 = vld [vmem:[#allocation6 + $0x40] sm:$0xff]  ;;  %v790_v38 = vld [vmem:[#allocation6 + $0x50] sm:$0xff]  ;;  %v791_v39 = vld [vmem:[#allocation6 + $0x58] sm:$0xff] }
  0x6b   :  { %1656 = vmatpush1.bf16.msra.mxu0 %v1655_v20  ;;  %427 = vmatmul.mubr.f32.gmra.mrb[6].mxu1 %v2060_v26  ;;  %v820_v20 = vld [vmem:[#allocation6 + $0x140] sm:$0xff]  ;;  %v1719_v36 = vpack.c.bf16 %v789_v33, %v788_v30  ;;  %v827_v41 = vld [vmem:[#allocation6 + $0x178] sm:$0xff]  ;;  %v1723_v42 = vpack.c.bf16 %v791_v39, %v790_v38  ;;  %v793_v48 = vld [vmem:[#allocation6 + $0x68] sm:$0xff] }
  0x6c   :  { %1658 = vmatprep.subr.bf16.mxu0 %v1657_v23  ;;  %431 = vmatprep.mubr.f32.mxu1 %v2062_v29  ;;  %v1749_v22 = vpack.c.bf16 %v821_v21, %v820_v20  ;;  %v822_v23 = vld [vmem:[#allocation6 + $0x150] sm:$0xff]  ;;  %v808_v44 = vld [vmem:[#allocation6 + $0xe0] sm:$0xff] }
  0x6d   :  { %1716 = vmatpush3.bf16.msra.mxu1 %v1715_v45  ;;  %v1753_v25 = vpack.c.bf16 %v823_v24, %v822_v23  ;;  %v809_v45 = vld [vmem:[#allocation6 + $0xe8] sm:$0xff]  ;;  %v794_v55 = vld [vmem:[#allocation6 + $0x70] sm:$0xff] }
  0x6f   :  { %1660 = vmatpush1.bf16.msra.mxu0 %v1659_v34  ;;  %432 = vmatmul.mubr.f32.gmra.mrb[8].mxu1 %v2066_v40  ;;  %v806_v34 = vld [vmem:[#allocation6 + $0xd0] sm:$0xff] }
  0x70   :  { %1662 = vmatprep.subr.bf16.mxu0 %v1661_v37  ;;  %436 = vmatprep.mubr.f32.mxu1 %v2068_v43  ;;  %v1721_v37 = vpack.c.bf16 %v807_v35, %v806_v34 }
  0x73   :  { %1664 = vmatpush1.bf16.msra.mxu0 %v1663_v46  ;;  %437 = vmatmul.mubr.f32.gmra.mrb[10].mxu1 %v68_v51  ;;  %v1725_v46 = vpack.c.bf16 %v809_v45, %v808_v44 }
  0x74   :  { %1666 = vmatprep.subr.bf16.mxu0 %v1665_v47  ;;  %441 = vmatprep.mubr.f32.mxu1 %v71_v52  ;;  %v792_v47 = vld [vmem:[#allocation6 + $0x60] sm:$0xff] }
  0x75   :  { %v1727_v49 = vpack.c.bf16 %v793_v48, %v792_v47 }
  0x77   :  { %1668 = vmatpush1.bf16.msra.mxu0 %v1667_v56  ;;  %442 = vmatmul.mubr.f32.gmra.mrb[12].mxu1 %v70_v57  ;;  %v795_v56 = vld [vmem:[#allocation6 + $0x78] sm:$0xff] }
  0x78   :  { %446 = vmatprep.mubr.f32.mxu1 %v73_v60  ;;  %1734 = vmatprep.subr.bf16.mxu0 %v1733_v58 }
  0x7a   :  { %251 = vmatmul.mubr.f32.vlgmr.msra.gmra.mrb[0].mxu0 %v2042_v50  ;;  %v78_v50 = vld [vmem:[#allocation2 + $0xa0] sm:$0xff] }
  0x7b   :  { %256 = vmatprep.mubr.f32.mxu0 %v2044_v53  ;;  %447 = vmatmul.mubr.f32.gmra.mrb[14].mxu1 %v72_v0  ;;  %v81_v53 = vld [vmem:[#allocation2 + $0xb8] sm:$0xff] }
  0x7c   :  { %451 = vmatprep.mubr.f32.mxu1 %v75_v1  ;;  %1736 = vmatpush3.bf16.msra.mxu0 %v1733_v58 }
  0x7d   :  { %1738 = vmatprep.subr.bf16.mxu0 %v1737_v2 }
  0x7e   :  { %257 = vmatmul.mubr.f32.gmra.mrb[2].mxu0 %v2048_v59  ;;  %v80_v59 = vld [vmem:[#allocation2 + $0xb0] sm:$0xff] }
  0x7f   :  { %262 = vmatprep.mubr.f32.mxu0 %v2050_v61  ;;  %452 = vmatmul.mubr.f32.gmra.mrb[16].mxu1 %v74_v3  ;;  %v83_v61 = vld [vmem:[#allocation2 + $0xc8] sm:$0xff] }
  0x80   :  { %456 = vmatprep.mubr.f32.mxu1 %v77_v4  ;;  %1740 = vmatpush3.bf16.msra.mxu0 %v1737_v2 }
  0x82   :  { %263 = vmatmul.mubr.f32.gmra.mrb[4].mxu0 %v2054_v11  ;;  %v86_v11 = vld [vmem:[#allocation2 + $0xe0] sm:$0xff] }
  0x83   :  { %268 = vmatprep.mubr.f32.mxu0 %v2056_v15  ;;  %457 = vmatmul.mubr.f32.gmra.mrb[18].mxu1 %v76_v5  ;;  %v817_v15 = vld [vmem:[#allocation6 + $0x128] sm:$0xff] }
  0x84   :  { %461 = vmatprep.mubr.f32.mxu1 %v79_v6  ;;  %v1741_v16 = vpack.c.bf16 %v817_v15, %v816_v14 }
  0x86   :  { %269 = vmatmul.mubr.f32.gmra.mrb[6].mxu0 %v2060_v26  ;;  %1742 = vmatprep.subr.bf16.mxu0 %v1741_v16  ;;  %v824_v26 = vld [vmem:[#allocation6 + $0x160] sm:$0xff] }
  0x87   :  { %274 = vmatprep.mubr.f32.mxu0 %v2062_v29  ;;  %462 = vmatmul.mubr.f32.gmra.mrb[20].mxu1 %v78_v50  ;;  %v805_v29 = vld [vmem:[#allocation6 + $0xc8] sm:$0xff]  ;;  %v1757_v31 = vpack.c.bf16 %v825_v27, %v824_v26 }
  0x88   :  { %466 = vmatprep.mubr.f32.mxu1 %v81_v53  ;;  %1744 = vmatpush3.bf16.msra.mxu0 %v1741_v16  ;;  %v1717_v32 = vpack.c.bf16 %v805_v29, %v804_v28 }
  0x89   :  { %1746 = vmatprep.subr.bf16.mxu0 %v1745_v19 }
  0x8a   :  { %275 = vmatmul.mubr.f32.gmra.mrb[8].mxu0 %v2066_v40  ;;  %1718 = vmatprep.subr.bf16.mxu1 %v1717_v32  ;;  %v826_v40 = vld [vmem:[#allocation6 + $0x170] sm:$0xff] }
  0x8b   :  { %280 = vmatprep.mubr.f32.mxu0 %v2068_v43  ;;  %467 = vmatmul.mubr.f32.gmra.mrb[22].mxu1 %v80_v59  ;;  %v1761_v43 = vpack.c.bf16 %v827_v41, %v826_v40 }
  0x8c   :  { %471 = vmatprep.mubr.f32.mxu1 %v83_v61  ;;  %1748 = vmatpush3.bf16.msra.mxu0 %v1745_v19 }
  0x8d   :  { %1750 = vmatprep.subr.bf16.mxu0 %v1749_v22  ;;  %1720 = vmatpush3.bf16.msra.mxu1 %v1719_v36 }
  0x8e   :  { %281 = vmatmul.mubr.f32.gmra.mrb[10].mxu0 %v68_v51  ;;  %1722 = vmatprep.subr.bf16.mxu1 %v1721_v37  ;;  %v810_v51 = vld [vmem:[#allocation6 + $0xf0] sm:$0xff] }
  0x8f   :  { %286 = vmatprep.mubr.f32.mxu0 %v71_v52  ;;  %472 = vmatmul.mubr.f32.gmra.mrb[24].mxu1 %v82_v7  ;;  %v811_v52 = vld [vmem:[#allocation6 + $0xf8] sm:$0xff] }
  0x90   :  { %476 = vmatprep.mubr.f32.mxu1 %v85_v8  ;;  %1752 = vmatpush3.bf16.msra.mxu0 %v1749_v22  ;;  %v1729_v54 = vpack.c.bf16 %v811_v52, %v810_v51 }
  0x91   :  { %1754 = vmatprep.subr.bf16.mxu0 %v1753_v25  ;;  %1724 = vmatpush3.bf16.msra.mxu1 %v1723_v42 }
  0x92   :  { %287 = vmatmul.mubr.f32.gmra.mrb[12].mxu0 %v70_v57  ;;  %1726 = vmatprep.subr.bf16.mxu1 %v1725_v46  ;;  %v1731_v57 = vpack.c.bf16 %v795_v56, %v794_v55 }
  0x93   :  { %292 = vmatprep.mubr.f32.mxu0 %v73_v60  ;;  %477 = vmatmul.mubr.f32.gmra.mrb[26].mxu1 %v84_v9 }
  0x94   :  { %481 = vmatprep.mubr.f32.mxu1 %v87_v10  ;;  %1756 = vmatpush3.bf16.msra.mxu0 %v1753_v25 }
  0x95   :  { %1758 = vmatprep.subr.bf16.mxu0 %v1757_v31  ;;  %1728 = vmatpush3.bf16.msra.mxu1 %v1727_v49 }
  0x96   :  { %293 = vmatmul.mubr.f32.gmra.mrb[14].mxu0 %v72_v0  ;;  %1730 = vmatprep.subr.bf16.mxu1 %v1729_v54 }
  0x97   :  { %298 = vmatprep.mubr.f32.mxu0 %v75_v1  ;;  %482 = vmatmul.mubr.f32.gmra.mrb[28].mxu1 %v86_v11 }
  0x98   :  { %486 = vmatprep.mubr.f32.mxu1 %v89_v12  ;;  %1760 = vmatpush3.bf16.msra.mxu0 %v1757_v31 }
  0x99   :  { %1762 = vmatprep.subr.bf16.mxu0 %v1761_v43  ;;  %1732 = vmatpush3.bf16.msra.mxu1 %v1731_v57 }
  0x9a   :  { %299 = vmatmul.mubr.f32.gmra.mrb[16].mxu0 %v74_v3 }
  0x9b   :  { %304 = vmatprep.mubr.f32.mxu0 %v77_v4  ;;  %487 = vmatmul.mubr.f32.gmra.mrb[30].mxu1 %v88_v13 }
  0x9c   :  { %1764 = vmatpush3.bf16.msra.mxu0 %v1761_v43 }
  0x9e   :  { %305 = vmatmul.mubr.f32.gmra.mrb[18].mxu0 %v76_v5 }
  0x9f   :  { %310 = vmatprep.mubr.f32.mxu0 %v79_v6 }
  0xa2   :  { %311 = vmatmul.mubr.f32.gmra.mrb[20].mxu0 %v78_v50 }
  0xa3   :  { %316 = vmatprep.mubr.f32.mxu0 %v81_v53 }
  0xa6   :  { %317 = vmatmul.mubr.f32.gmra.mrb[22].mxu0 %v80_v59 }
  0xa7   :  { %322 = vmatprep.mubr.f32.mxu0 %v83_v61 }
  0xaa   :  { %323 = vmatmul.mubr.f32.gmra.mrb[24].mxu0 %v82_v7 }
  0xab   :  { %328 = vmatprep.mubr.f32.mxu0 %v85_v8 }
  0xae   :  { %329 = vmatmul.mubr.f32.gmra.mrb[26].mxu0 %v84_v9 }
  0xaf   :  { %334 = vmatprep.mubr.f32.mxu0 %v87_v10 }
  0xb2   :  { %335 = vmatmul.mubr.f32.gmra.mrb[28].mxu0 %v86_v11 }
  0xb3   :  { %340 = vmatprep.mubr.f32.mxu0 %v89_v12 }
  0xb6   :  { %341 = vmatmul.mubr.f32.gmra.mrb[30].mxu0 %v88_v13 }
 0x132   :  { %v1389_v58 = vpop.f32.mrb[0].mxu1 }
 0x133   :  { %v1390_v60 = vpop.f32.mrb[1].mxu1 }
 0x134   :  { %v1391_v62 = vadd.f32 %v1390_v60, %v1389_v58 }
 0x136   :  { %v542_v63 = vmin.f32 %v1391_v62, 0.0  ;;  %v1392_v0 = vpop.f32.mrb[2].mxu1  ;;  %vm494_vm0 = vcmp.gt.f32.partialorder %v1391_v62, 0.0 }
 0x137   :  { %v1393_v1 = vpop.f32.mrb[3].mxu1 }
 0x138   :  { %v592_v2 = vmul.f32 1.442695, %v542_v63  ;;  %v1394_v3 = vadd.f32 %v1393_v1, %v1392_v0 }
 0x13a   :  { %1774 = vpow2.f32 %v592_v2  ;;  %v545_v4 = vmin.f32 %v1394_v3, 0.0  ;;  %v1395_v5 = vpop.f32.mrb[4].mxu1  ;;  %vm497_vm1 = vcmp.gt.f32.partialorder %v1394_v3, 0.0 }
 0x13b   :  { %v1396_v6 = vpop.f32.mrb[5].mxu1 }
 0x13c   :  { %v598_v50 = vmul.f32 1.442695, %v545_v4  ;;  %v1397_v53 = vadd.f32 %v1396_v6, %v1395_v5 }
 0x13e   :  { %1776 = vpow2.f32 %v598_v50  ;;  %v548_v59 = vmin.f32 %v1397_v53, 0.0  ;;  %v1398_v61 = vpop.f32.mrb[6].mxu1  ;;  %vm500_vm2 = vcmp.gt.f32.partialorder %v1397_v53, 0.0 }
 0x13f   :  { %v1399_v7 = vpop.f32.mrb[7].mxu1 }
 0x140   :  { %v604_v8 = vmul.f32 1.442695, %v548_v59  ;;  %v1400_v9 = vadd.f32 %v1399_v7, %v1398_v61 }
 0x142   :  { %1778 = vpow2.f32 %v604_v8  ;;  %v551_v10 = vmin.f32 %v1400_v9, 0.0  ;;  %v1401_v11 = vpop.f32.mrb[8].mxu1  ;;  %vm503_vm3 = vcmp.gt.f32.partialorder %v1400_v9, 0.0 }
 0x143   :  { %v1402_v12 = vpop.f32.mrb[9].mxu1 }
 0x144   :  { %v1775_v13 = vpop.eup %1774  ;;  %v610_v14 = vmul.f32 1.442695, %v551_v10  ;;  %v2082_v15 = vadd.f32 %v1402_v12, %v1401_v11 }
 0x145   :  { %v1294_v16 = vadd.f32 -1.0, %v1775_v13 }
 0x146   :  { %1780 = vpow2.f32 %v610_v14  ;;  %v554_v17 = vmin.f32 %v2082_v15, 0.0  ;;  %v1404_v18 = vpop.f32.mrb[10].mxu1  ;;  %vm506_vm4 = vcmp.gt.f32.partialorder %v2082_v15, 0.0 }
 0x147   :  { %v1405_v19 = vpop.f32.mrb[11].mxu1  ;;  %v734_v20 = vsel %vm494_vm0, %v1391_v62, %v1294_v16 }
 0x148   :  { %v1777_v21 = vpop.eup %1776  ;;  %v616_v22 = vmul.f32 1.442695, %v554_v17  ;;  %v2085_v23 = vadd.f32 %v1405_v19, %v1404_v18  ;;  %1581 = vmatprep.mubr.f32.mxu0 %v734_v20 }
 0x149   :  { %v1297_v24 = vadd.f32 -1.0, %v1777_v21 }
 0x14a   :  { %1782 = vpow2.f32 %v616_v22  ;;  %v557_v25 = vmin.f32 %v2085_v23, 0.0  ;;  %v1407_v26 = vpop.f32.mrb[12].mxu1  ;;  %vm509_vm5 = vcmp.gt.f32.partialorder %v2085_v23, 0.0 }
 0x14b   :  { %v737_v27 = vsel %vm497_vm1, %v1394_v3, %v1297_v24  ;;  %v1408_v28 = vpop.f32.mrb[13].mxu1 }
 0x14c   :  { %v1779_v29 = vpop.eup %1778  ;;  %v622_v30 = vmul.f32 1.442695, %v557_v25  ;;  %v2088_v31 = vadd.f32 %v1408_v28, %v1407_v26  ;;  %1582 = vmatmul.mubr.f32.vlgmr.msra.gmra.mrb[32].mxu0 %v737_v27 }
 0x14d   :  { %v2090_v32 = vpop.f32.mrb[0].mxu0  ;;  %v1300_v33 = vadd.f32 -1.0, %v1779_v29 }
 0x14e   :  { %v540_v34 = vmin.f32 %v2090_v32, 0.0  ;;  %v2093_v35 = vpop.f32.mrb[1].mxu0  ;;  %1784 = vpow2.f32 %v622_v30  ;;  %v560_v36 = vmin.f32 %v2088_v31, 0.0  ;;  %v1410_v37 = vpop.f32.mrb[14].mxu1  ;;  %vm492_vm6 = vcmp.gt.f32.partialorder %v2090_v32, 0.0 }
 0x14f   :  { %v541_v38 = vmin.f32 %v2093_v35, 0.0  ;;  %v1411_v39 = vpop.f32.mrb[15].mxu1  ;;  %v740_v40 = vsel %vm500_vm2, %v1397_v53, %v1300_v33  ;;  %vm493_vm7 = vcmp.gt.f32.partialorder %v2093_v35, 0.0  ;;  %vm512_vm8 = vcmp.gt.f32.partialorder %v2088_v31, 0.0 }
 0x150   :  { %v1781_v41 = vpop.eup %1780  ;;  %v588_v42 = vmul.f32 1.442695, %v540_v34  ;;  %v628_v43 = vmul.f32 1.442695, %v560_v36  ;;  %v2097_v44 = vadd.f32 %v1411_v39, %v1410_v37  ;;  %1584 = vmatprep.mubr.f32.mxu0 %v740_v40 }
 0x151   :  { %v590_v45 = vmul.f32 1.442695, %v541_v38  ;;  %v2099_v46 = vpop.f32.mrb[2].mxu0  ;;  %v1303_v47 = vadd.f32 -1.0, %v1781_v41 }
 0x152   :  { %1786 = vpow2.f32 %v588_v42  ;;  %v543_v48 = vmin.f32 %v2099_v46, 0.0  ;;  %v2102_v49 = vpop.f32.mrb[3].mxu0  ;;  %v1413_v51 = vpop.f32.mrb[16].mxu1  ;;  %v563_v58 = vmin.f32 %v2097_v44, 0.0  ;;  %vm495_vm9 = vcmp.gt.f32.partialorder %v2099_v46, 0.0 }
 0x153   :  { %1788 = vpow2.f32 %v590_v45  ;;  %v544_v52 = vmin.f32 %v2102_v49, 0.0  ;;  %v1414_v54 = vpop.f32.mrb[17].mxu1  ;;  %v743_v55 = vsel %vm503_vm3, %v1400_v9, %v1303_v47  ;;  %vm496_vm10 = vcmp.gt.f32.partialorder %v2102_v49, 0.0 }
 0x154   :  { %v1783_v56 = vpop.eup %1782  ;;  %v594_v57 = vmul.f32 1.442695, %v543_v48  ;;  %1790 = vpow2.f32 %v628_v43  ;;  %v2107_v60 = vadd.f32 %v1414_v54, %v1413_v51  ;;  %1585 = vmatmul.mubr.f32.gmra.mrb[34].mxu0 %v743_v55  ;;  %v634_v61 = vmul.f32 1.442695, %v563_v58 }
 0x155   :  { %v596_v62 = vmul.f32 1.442695, %v544_v52  ;;  %v2109_v63 = vpop.f32.mrb[4].mxu0  ;;  %v1306_v0 = vadd.f32 -1.0, %v1783_v56  ;;  %vm515_vm11 = vcmp.gt.f32.partialorder %v2097_v44, 0.0 }
 0x156   :  { %1792 = vpow2.f32 %v594_v57  ;;  %v546_v1 = vmin.f32 %v2109_v63, 0.0  ;;  %v2112_v2 = vpop.f32.mrb[5].mxu0  ;;  %v566_v3 = vmin.f32 %v2107_v60, 0.0  ;;  %v1416_v4 = vpop.f32.mrb[18].mxu1  ;;  %vm498_vm12 = vcmp.gt.f32.partialorder %v2109_v63, 0.0 }
 0x157   :  { %1794 = vpow2.f32 %v596_v62  ;;  %v547_v5 = vmin.f32 %v2112_v2, 0.0  ;;  %v1417_v6 = vpop.f32.mrb[19].mxu1  ;;  %v746_v50 = vsel %vm506_vm4, %v2082_v15, %v1306_v0  ;;  %vm499_vm13 = vcmp.gt.f32.partialorder %v2112_v2, 0.0 }
 0x158   :  { %v1785_v53 = vpop.eup %1784  ;;  %v600_v59 = vmul.f32 1.442695, %v546_v1  ;;  %v2119_v7 = vadd.f32 %v1417_v6, %v1416_v4  ;;  %1587 = vmatprep.mubr.f32.mxu0 %v746_v50  ;;  %v640_v10 = vmul.f32 1.442695, %v566_v3  ;;  %vm518_vm15 = vcmp.gt.f32.partialorder %v2107_v60, 0.0 }
 0x159   :  { %v602_v8 = vmul.f32 1.442695, %v547_v5  ;;  %v2122_v9 = vpop.f32.mrb[6].mxu0  ;;  %v1309_v11 = vadd.f32 -1.0, %v1785_v53 }
 0x15a   :  { %1796 = vpow2.f32 %v600_v59  ;;  %v549_v12 = vmin.f32 %v2122_v9, 0.0  ;;  %v2125_v13 = vpop.f32.mrb[7].mxu0  ;;  %v1419_v14 = vpop.f32.mrb[20].mxu1  ;;  %v569_v20 = vmin.f32 %v2119_v7, 0.0  ;;  %vm501_vm14 = vcmp.gt.f32.partialorder %v2122_v9, 0.0 }
 0x15b   :  { %1798 = vpow2.f32 %v602_v8  ;;  %v550_v15 = vmin.f32 %v2125_v13, 0.0  ;;  %v1420_v16 = vpop.f32.mrb[21].mxu1  ;;  %v749_v17 = vsel %vm509_vm5, %v2085_v23, %v1309_v11  ;;  %vm502_vm0 = vcmp.gt.f32.partialorder %v2125_v13, 0.0 }
 0x15c   :  { %v1787_v18 = vpop.eup %1786  ;;  %1800 = vpow2.f32 %v634_v61  ;;  %v606_v19 = vmul.f32 1.442695, %v549_v12  ;;  %v2131_v21 = vadd.f32 %v1420_v16, %v1419_v14  ;;  %1588 = vmatmul.mubr.f32.gmra.mrb[36].mxu0 %v749_v17  ;;  %v646_v38 = vmul.f32 1.442695, %v569_v20 }
 0x15d   :  { %v1789_v22 = vpop.eup %1788  ;;  %v1292_v24 = vadd.f32 -1.0, %v1787_v18  ;;  %v608_v25 = vmul.f32 1.442695, %v550_v15  ;;  %v2134_v26 = vpop.f32.mrb[8].mxu0  ;;  %1802 = vpow2.f32 %v640_v10  ;;  %vm521_vm1 = vcmp.gt.f32.partialorder %v2119_v7, 0.0 }
 0x15e   :  { %v1791_v27 = vpop.eup %1790  ;;  %1804 = vpow2.f32 %v606_v19  ;;  %v552_v23 = vmin.f32 %v2134_v26, 0.0  ;;  %v2137_v28 = vpop.f32.mrb[9].mxu0  ;;  %v1293_v29 = vadd.f32 -1.0, %v1789_v22  ;;  %v572_v40 = vmin.f32 %v2131_v21, 0.0 }
 0x15f   :  { %v1422_v30 = vpop.f32.mrb[22].mxu1  ;;  %1806 = vpow2.f32 %v608_v25  ;;  %v553_v33 = vmin.f32 %v2137_v28, 0.0  ;;  %v732_v42 = vsel %vm492_vm6, %v2090_v32, %v1292_v24  ;;  %v1312_v48 = vadd.f32 -1.0, %v1791_v27 }
 0x160   :  { %v1423_v34 = vpop.f32.mrb[23].mxu1  ;;  %v1793_v36 = vpop.eup %1792  ;;  %v612_v37 = vmul.f32 1.442695, %v552_v23  ;;  %v733_v39 = vsel %vm493_vm7, %v2093_v35, %v1293_v29  ;;  %v652_v35 = vmul.f32 1.442695, %v572_v40  ;;  %vm505_vm2 = vcmp.gt.f32.partialorder %v2137_v28, 0.0 }
 0x161   :  { %v1795_v41 = vpop.eup %1794  ;;  %v614_v43 = vmul.f32 1.442695, %v553_v33  ;;  %v2150_v45 = vpop.f32.mrb[10].mxu0  ;;  %892 = vmatprep.mubr.f32.mxu1 %v733_v39  ;;  %v2152_v47 = vadd.f32 %v1423_v34, %v1422_v30  ;;  %v1295_v54 = vadd.f32 -1.0, %v1793_v36  ;;  %v752_v6 = vsel %vm512_vm8, %v2088_v31, %v1312_v48 }
 0x162   :  { %1808 = vpow2.f32 %v612_v37  ;;  %v555_v51 = vmin.f32 %v2150_v45, 0.0  ;;  %v2155_v52 = vpop.f32.mrb[11].mxu0  ;;  %893 = vmatmul.mubr.f32.vlgmr.msra.gmra.mrb[32].mxu1 %v732_v42  ;;  %v1425_v55 = vpop.f32.mrb[24].mxu1  ;;  %v1296_v32 = vadd.f32 -1.0, %v1795_v41  ;;  %1590 = vmatprep.mubr.f32.mxu0 %v752_v6  ;;  %vm504_vm3 = vcmp.gt.f32.partialorder %v2134_v26, 0.0 }
 0x163   :  { %1810 = vpow2.f32 %v614_v43  ;;  %v556_v56 = vmin.f32 %v2155_v52, 0.0  ;;  %v1426_v57 = vpop.f32.mrb[25].mxu1  ;;  %v575_v0 = vmin.f32 %v2152_v47, 0.0  ;;  %v735_v61 = vsel %vm495_vm9, %v2099_v46, %v1295_v54 }
 0x164   :  { %v1797_v58 = vpop.eup %1796  ;;  %1812 = vpow2.f32 %v646_v38  ;;  %v618_v62 = vmul.f32 1.442695, %v555_v51  ;;  %v736_v5 = vsel %vm496_vm10, %v2102_v49, %v1296_v32  ;;  %v2180_v46 = vadd.f32 %v1426_v57, %v1425_v55 }
 0x165   :  { %v1799_v1 = vpop.eup %1798  ;;  %v620_v3 = vmul.f32 1.442695, %v556_v56  ;;  %v2161_v4 = vpop.f32.mrb[12].mxu0  ;;  %1814 = vpow2.f32 %v652_v35  ;;  %897 = vmatprep.mubr.f32.mxu1 %v736_v5  ;;  %v658_v8 = vmul.f32 1.442695, %v575_v0  ;;  %v1298_v10 = vadd.f32 -1.0, %v1797_v58 }
 0x166   :  { %v1801_v50 = vpop.eup %1800  ;;  %v558_v53 = vmin.f32 %v2161_v4, 0.0  ;;  %v2170_v59 = vpop.f32.mrb[13].mxu0  ;;  %898 = vmatmul.mubr.f32.gmra.mrb[34].mxu1 %v735_v61  ;;  %v1299_v49 = vadd.f32 -1.0, %v1799_v1  ;;  %v578_v23 = vmin.f32 %v2180_v46, 0.0  ;;  %vm508_vm4 = vcmp.gt.f32.partialorder %v2155_v52, 0.0 }
 0x167   :  { %v1428_v11 = vpop.f32.mrb[26].mxu1  ;;  %v2175_v12 = vpop.eup %1802  ;;  %1816 = vpow2.f32 %v620_v3  ;;  %v559_v31 = vmin.f32 %v2170_v59, 0.0  ;;  %v1315_v22 = vadd.f32 -1.0, %v1801_v50  ;;  %v738_v27 = vsel %vm498_vm12, %v2109_v63, %v1298_v10 }
 0x168   :  { %v1429_v14 = vpop.f32.mrb[27].mxu1  ;;  %v1805_v15 = vpop.eup %1804  ;;  %1818 = vpow2.f32 %v618_v62  ;;  %v624_v16 = vmul.f32 1.442695, %v558_v53  ;;  %v739_v20 = vsel %vm499_vm13, %v2112_v2, %v1299_v49  ;;  %v664_v41 = vmul.f32 1.442695, %v578_v23 }
 0x169   :  { %v1807_v17 = vpop.eup %1806  ;;  %v626_v18 = vmul.f32 1.442695, %v559_v31  ;;  %1820 = vpow2.f32 %v658_v8  ;;  %v2183_v19 = vpop.f32.mrb[14].mxu0  ;;  %902 = vmatprep.mubr.f32.mxu1 %v739_v20  ;;  %v1301_v29 = vadd.f32 -1.0, %v1805_v15  ;;  %v755_v38 = vsel %vm515_vm11, %v2097_v44, %v1315_v22 }
 0x16a   :  { %v561_v24 = vmin.f32 %v2183_v19, 0.0  ;;  %v2189_v25 = vpop.f32.mrb[15].mxu0  ;;  %v1431_v30 = vpop.f32.mrb[28].mxu1  ;;  %1822 = vpow2.f32 %v624_v16  ;;  %903 = vmatmul.mubr.f32.gmra.mrb[36].mxu1 %v738_v27  ;;  %v1302_v2 = vadd.f32 -1.0, %v1807_v17  ;;  %1591 = vmatmul.mubr.f32.gmra.mrb[38].mxu0 %v755_v38  ;;  %v2204_v43 = vadd.f32 %v1429_v14, %v1428_v11 }
 0x16b   :  { %v562_v33 = vmin.f32 %v2189_v25, 0.0  ;;  %v1432_v34 = vpop.f32.mrb[29].mxu1  ;;  %1824 = vpow2.f32 %v626_v18  ;;  %v741_v44 = vsel %vm501_vm14, %v2122_v9, %v1301_v29  ;;  %v1318_v5 = vadd.f32 -1.0, %v2175_v12 }
 0x16c   :  { %v1809_v36 = vpop.eup %1808  ;;  %v630_v37 = vmul.f32 1.442695, %v561_v24  ;;  %v742_v42 = vsel %vm502_vm0, %v2125_v13, %v1302_v2  ;;  %v581_v57 = vmin.f32 %v2204_v43, 0.0  ;;  %v2222_v6 = vadd.f32 %v1432_v34, %v1431_v30 }
 0x16d   :  { %v1811_v63 = vpop.eup %1810  ;;  %v632_v39 = vmul.f32 1.442695, %v562_v33  ;;  %v2201_v40 = vpop.f32.mrb[16].mxu0  ;;  %907 = vmatprep.mubr.f32.mxu1 %v742_v42  ;;  %v1304_v55 = vadd.f32 -1.0, %v1809_v36  ;;  %v758_v12 = vsel %vm518_vm15, %v2107_v60, %v1318_v5  ;;  %vm507_vm5 = vcmp.gt.f32.partialorder %v2150_v45, 0.0 }
 0x16e   :  { %v1813_v48 = vpop.eup %1812  ;;  %v564_v51 = vmin.f32 %v2201_v40, 0.0  ;;  %v2207_v35 = vpop.f32.mrb[17].mxu0  ;;  %v1305_v54 = vadd.f32 -1.0, %v1811_v63  ;;  %1826 = vpow2.f32 %v630_v37  ;;  %908 = vmatmul.mubr.f32.gmra.mrb[38].mxu1 %v741_v44  ;;  %v670_v53 = vmul.f32 1.442695, %v581_v57  ;;  %1593 = vmatprep.mubr.f32.mxu0 %v758_v12 }
 0x16f   :  { %v1434_v56 = vpop.f32.mrb[30].mxu1  ;;  %v2212_v32 = vpop.eup %1814  ;;  %v565_v13 = vmin.f32 %v2207_v35, 0.0  ;;  %1828 = vpow2.f32 %v632_v39  ;;  %v744_v10 = vsel %vm504_vm3, %v2134_v26, %v1304_v55  ;;  %v584_v14 = vmin.f32 %v2222_v6, 0.0 }
 0x170   :  { %v1435_v58 = vpop.f32.mrb[31].mxu1  ;;  %v636_v62 = vmul.f32 1.442695, %v564_v51  ;;  %v745_v9 = vsel %vm505_vm2, %v2137_v28, %v1305_v54  ;;  %1830 = vpow2.f32 %v664_v41  ;;  %v1321_v18 = vadd.f32 -1.0, %v1813_v48 }
 0x171   :  { %v1817_v0 = vpop.eup %1816  ;;  %v638_v1 = vmul.f32 1.442695, %v565_v13  ;;  %v2219_v3 = vpop.f32.mrb[18].mxu0  ;;  %912 = vmatprep.mubr.f32.mxu1 %v745_v9  ;;  %v2237_v22 = vadd.f32 %v1435_v58, %v1434_v56  ;;  %v676_v27 = vmul.f32 1.442695, %v584_v14  ;;  %vm510_vm6 = vcmp.gt.f32.partialorder %v2161_v4, 0.0 }
 0x172   :  { %v1819_v50 = vpop.eup %1818  ;;  %v567_v61 = vmin.f32 %v2219_v3, 0.0  ;;  %v2225_v8 = vpop.f32.mrb[19].mxu0  ;;  %v1308_v11 = vadd.f32 -1.0, %v1817_v0  ;;  %913 = vmatmul.mubr.f32.gmra.mrb[40].mxu1 %v744_v10  ;;  %vm511_vm7 = vcmp.gt.f32.partialorder %v2170_v59, 0.0  ;;  %vm524_vm8 = vcmp.gt.f32.partialorder %v2131_v21, 0.0 }
 0x173   :  { %v1821_v28 = vpop.eup %1820  ;;  %1832 = vpow2.f32 %v638_v1  ;;  %v568_v31 = vmin.f32 %v2225_v8, 0.0  ;;  %v1307_v20 = vadd.f32 -1.0, %v1819_v50  ;;  %v587_v2 = vmin.f32 %v2237_v22, 0.0 }
 0x174   :  { %1834 = vpow2.f32 %v636_v62  ;;  %v642_v49 = vmul.f32 1.442695, %v567_v61  ;;  %v748_v15 = vsel %vm508_vm4, %v2155_v52, %v1308_v11  ;;  %v1823_v26 = vpop.eup %1822  ;;  %v761_v52 = vsel %vm521_vm1, %v2119_v7, %v1321_v18 }
 0x175   :  { %v644_v16 = vmul.f32 1.442695, %v568_v31  ;;  %v2235_v17 = vpop.f32.mrb[20].mxu0  ;;  %917 = vmatprep.mubr.f32.mxu1 %v748_v15  ;;  %v1825_v24 = vpop.eup %1824  ;;  %1836 = vpow2.f32 %v670_v53  ;;  %1594 = vmatmul.mubr.f32.gmra.mrb[40].mxu0 %v761_v52  ;;  %v747_v33 = vsel %vm507_vm5, %v2150_v45, %v1307_v20  ;;  %v1310_v63 = vadd.f32 -1.0, %v1823_v26 }
 0x176   :  { %v570_v60 = vmin.f32 %v2235_v17, 0.0  ;;  %v2240_v23 = vpop.f32.mrb[21].mxu0  ;;  %918 = vmatmul.mubr.f32.gmra.mrb[42].mxu1 %v747_v33  ;;  %v1311_v38 = vadd.f32 -1.0, %v1825_v24  ;;  %v682_v51 = vmul.f32 1.442695, %v587_v2  ;;  %v1324_v55 = vadd.f32 -1.0, %v2212_v32 }
 0x177   :  { %1838 = vpow2.f32 %v644_v16  ;;  %v571_v29 = vmin.f32 %v2240_v23, 0.0  ;;  %v750_v54 = vsel %vm510_vm6, %v2161_v4, %v1310_v63  ;;  %vm527_vm9 = vcmp.gt.f32.partialorder %v2152_v47, 0.0 }
 0x178   :  { %1840 = vpow2.f32 %v642_v49  ;;  %v648_v30 = vmul.f32 1.442695, %v570_v60  ;;  %v1827_v34 = vpop.eup %1826  ;;  %v751_v42 = vsel %vm511_vm7, %v2170_v59, %v1311_v38  ;;  %v1327_v59 = vadd.f32 -1.0, %v1821_v28 }
 0x179   :  { %1842 = vpow2.f32 %v676_v27  ;;  %v650_v36 = vmul.f32 1.442695, %v571_v29  ;;  %v2249_v37 = vpop.f32.mrb[22].mxu0  ;;  %v1829_v39 = vpop.eup %1828  ;;  %922 = vmatprep.mubr.f32.mxu1 %v751_v42  ;;  %vm513_vm10 = vcmp.gt.f32.partialorder %v2183_v19, 0.0  ;;  %vm514_vm11 = vcmp.gt.f32.partialorder %v2189_v25, 0.0 }
 0x17a   :  { %1844 = vpow2.f32 %v648_v30  ;;  %v573_v7 = vmin.f32 %v2249_v37, 0.0  ;;  %v2254_v41 = vpop.f32.mrb[23].mxu0  ;;  %v1831_v45 = vpop.eup %1830  ;;  %923 = vmatmul.mubr.f32.gmra.mrb[44].mxu1 %v750_v54  ;;  %v1314_v58 = vadd.f32 -1.0, %v1829_v39  ;;  %v764_v4 = vsel %vm524_vm8, %v2131_v21, %v1324_v55 }
 0x17b   :  { %1846 = vpow2.f32 %v650_v36  ;;  %v574_v48 = vmin.f32 %v2254_v41, 0.0  ;;  %vm516_vm12 = vcmp.gt.f32.partialorder %v2201_v40, 0.0  ;;  %1596 = vmatprep.mubr.f32.mxu0 %v764_v4  ;;  %v767_v1 = vsel %vm527_vm9, %v2152_v47, %v1327_v59 }
 0x17c   :  { %v654_v44 = vmul.f32 1.442695, %v573_v7  ;;  %v754_v0 = vsel %vm514_vm11, %v2189_v25, %v1314_v58  ;;  %1597 = vmatmul.mubr.f32.gmra.mrb[42].mxu0 %v767_v1  ;;  %v1313_v53 = vadd.f32 -1.0, %v1827_v34  ;;  %vm530_vm13 = vcmp.gt.f32.partialorder %v2180_v46, 0.0 }
 0x17d   :  { %v1833_v56 = vpop.eup %1832  ;;  %v656_v13 = vmul.f32 1.442695, %v574_v48  ;;  %v2261_v57 = vpop.f32.mrb[24].mxu0  ;;  %927 = vmatprep.mubr.f32.mxu1 %v754_v0  ;;  %v1330_v28 = vadd.f32 -1.0, %v1831_v45  ;;  %vm517_vm14 = vcmp.gt.f32.partialorder %v2207_v35, 0.0  ;;  %vm520_vm15 = vcmp.gt.f32.partialorder %v2225_v8, 0.0 }
 0x17e   :  { %v1835_v62 = vpop.eup %1834  ;;  %v576_v32 = vmin.f32 %v2261_v57, 0.0  ;;  %v2270_v9 = vpop.f32.mrb[25].mxu0  ;;  %v1317_v21 = vadd.f32 -1.0, %v1833_v56  ;;  %v753_v25 = vsel %vm513_vm10, %v2183_v19, %v1313_v53  ;;  %vm533_vm0 = vcmp.gt.f32.partialorder %v2204_v43, 0.0 }
 0x17f   :  { %1848 = vpow2.f32 %v656_v13  ;;  %v1837_v5 = vpop.eup %1836  ;;  %v577_v50 = vmin.f32 %v2270_v9, 0.0  ;;  %v1316_v49 = vadd.f32 -1.0, %v1835_v62  ;;  %928 = vmatmul.mubr.f32.gmra.mrb[46].mxu1 %v753_v25  ;;  %v770_v19 = vsel %vm530_vm13, %v2180_v46, %v1330_v28 }
 0x180   :  { %1850 = vpow2.f32 %v682_v51  ;;  %v660_v10 = vmul.f32 1.442695, %v576_v32  ;;  %v757_v26 = vsel %vm517_vm14, %v2207_v35, %v1317_v21  ;;  %1599 = vmatprep.mubr.f32.mxu0 %v770_v19  ;;  %v1333_v35 = vadd.f32 -1.0, %v1837_v5 }
 0x181   :  { %v1839_v61 = vpop.eup %1838  ;;  %1852 = vpow2.f32 %v654_v44  ;;  %v2276_v11 = vpop.f32.mrb[26].mxu0  ;;  %v662_v47 = vmul.f32 1.442695, %v577_v50  ;;  %932 = vmatprep.mubr.f32.mxu1 %v757_v26  ;;  %v756_v29 = vsel %vm516_vm12, %v2201_v40, %v1316_v49  ;;  %vm519_vm1 = vcmp.gt.f32.partialorder %v2219_v3, 0.0 }
 0x182   :  { %v1841_v31 = vpop.eup %1840  ;;  %v2283_v12 = vpop.f32.mrb[27].mxu0  ;;  %v579_v15 = vmin.f32 %v2276_v11, 0.0  ;;  %v1320_v20 = vadd.f32 -1.0, %v1839_v61  ;;  %v773_v34 = vsel %vm533_vm0, %v2204_v43, %v1333_v35  ;;  %vm523_vm2 = vcmp.gt.f32.partialorder %v2240_v23, 0.0 }
 0x183   :  { %v1843_v14 = vpop.eup %1842  ;;  %v580_v16 = vmin.f32 %v2283_v12, 0.0  ;;  %1854 = vpow2.f32 %v662_v47  ;;  %v1319_v2 = vadd.f32 -1.0, %v1841_v31  ;;  %933 = vmatmul.mubr.f32.gmra.mrb[48].mxu1 %v756_v29  ;;  %1600 = vmatmul.mubr.f32.gmra.mrb[44].mxu0 %v773_v34  ;;  %vm536_vm3 = vcmp.gt.f32.partialorder %v2222_v6, 0.0 }
 0x184   :  { %v1845_v18 = vpop.eup %1844  ;;  %1856 = vpow2.f32 %v660_v10  ;;  %v666_v60 = vmul.f32 1.442695, %v579_v15  ;;  %v760_v46 = vsel %vm520_vm15, %v2225_v8, %v1320_v20  ;;  %v1336_v7 = vadd.f32 -1.0, %v1843_v14 }
 0x185   :  { %v1847_v24 = vpop.eup %1846  ;;  %v668_v27 = vmul.f32 1.442695, %v580_v16  ;;  %v2293_v52 = vpop.f32.mrb[28].mxu0  ;;  %937 = vmatprep.mubr.f32.mxu1 %v760_v46  ;;  %v759_v43 = vsel %vm519_vm1, %v2219_v3, %v1319_v2  ;;  %v1322_v44 = vadd.f32 -1.0, %v1845_v18  ;;  %vm522_vm4 = vcmp.gt.f32.partialorder %v2235_v17, 0.0 }
 0x186   :  { %v582_v30 = vmin.f32 %v2293_v52, 0.0  ;;  %v2302_v33 = vpop.f32.mrb[29].mxu0  ;;  %v1323_v38 = vadd.f32 -1.0, %v1847_v24  ;;  %vm526_vm5 = vcmp.gt.f32.partialorder %v2254_v41, 0.0  ;;  %v776_v56 = vsel %vm536_vm3, %v2222_v6, %v1336_v7 }
 0x187   :  { %v583_v36 = vmin.f32 %v2302_v33, 0.0  ;;  %1858 = vpow2.f32 %v668_v27  ;;  %938 = vmatmul.mubr.f32.gmra.mrb[50].mxu1 %v759_v43  ;;  %vm539_vm6 = vcmp.gt.f32.partialorder %v2237_v22, 0.0  ;;  %1602 = vmatprep.mubr.f32.mxu0 %v776_v56  ;;  %v762_v62 = vsel %vm522_vm4, %v2235_v17, %v1322_v44 }
 0x188   :  { %v672_v40 = vmul.f32 1.442695, %v582_v30  ;;  %1860 = vpow2.f32 %v666_v60  ;;  %v763_v48 = vsel %vm523_vm2, %v2240_v23, %v1323_v38  ;;  %vm529_vm7 = vcmp.gt.f32.partialorder %v2270_v9, 0.0 }
 0x189   :  { %v1849_v63 = vpop.eup %1848  ;;  %v674_v8 = vmul.f32 1.442695, %v583_v36  ;;  %v2308_v39 = vpop.f32.mrb[30].mxu0  ;;  %942 = vmatprep.mubr.f32.mxu1 %v763_v48  ;;  %vm525_vm8 = vcmp.gt.f32.partialorder %v2249_v37, 0.0  ;;  %vm532_vm9 = vcmp.gt.f32.partialorder %v2283_v12, 0.0  ;;  %vm528_vm10 = vcmp.gt.f32.partialorder %v2261_v57, 0.0 }
 0x18a   :  { %v1851_v45 = vpop.eup %1850  ;;  %v585_v42 = vmin.f32 %v2308_v39, 0.0  ;;  %v344_v51 = vpop.f32.mrb[31].mxu0  ;;  %v1326_v13 = vadd.f32 -1.0, %v1849_v63  ;;  %vm535_vm11 = vcmp.gt.f32.partialorder %v2302_v33, 0.0  ;;  %vm531_vm12 = vcmp.gt.f32.partialorder %v2276_v11, 0.0 }
 0x18b   :  { %v1853_v54 = vpop.eup %1852  ;;  %1862 = vpow2.f32 %v674_v8  ;;  %v586_v55 = vmin.f32 %v344_v51, 0.0  ;;  %v1339_v23 = vadd.f32 -1.0, %v1851_v45  ;;  %943 = vmatmul.mubr.f32.gmra.mrb[52].mxu1 %v762_v62  ;;  %vm538_vm13 = vcmp.gt.f32.partialorder %v344_v51, 0.0 }
 0x18c   :  { %1864 = vpow2.f32 %v672_v40  ;;  %v678_v3 = vmul.f32 1.442695, %v585_v42  ;;  %v766_v4 = vsel %vm526_vm5, %v2254_v41, %v1326_v13  ;;  %v1325_v32 = vadd.f32 -1.0, %v1853_v54 }
 0x18d   :  { %v680_v58 = vmul.f32 1.442695, %v586_v55  ;;  %v1855_v59 = vpop.eup %1854  ;;  %v779_v1 = vsel %vm539_vm6, %v2237_v22, %v1339_v23  ;;  %947 = vmatprep.mubr.f32.mxu1 %v766_v4  ;;  %vm534_vm14 = vcmp.gt.f32.partialorder %v2293_v52, 0.0  ;;  %vm537_vm15 = vcmp.gt.f32.partialorder %v2308_v39, 0.0 }
 0x18e   :  { %v1857_v0 = vpop.eup %1856  ;;  %v1329_v6 = vadd.f32 -1.0, %v1855_v59  ;;  %1603 = vmatmul.mubr.f32.gmra.mrb[46].mxu0 %v779_v1  ;;  %v765_v17 = vsel %vm525_vm8, %v2249_v37, %v1325_v32  ;;  %v2344_v32 = vld [vmem:[%s2447_s3] ss:$0 sm:$0xff] }
 0x18f   :  { %1866 = vpow2.f32 %v680_v58  ;;  %v1328_v41 = vadd.f32 -1.0, %v1857_v0  ;;  %948 = vmatmul.mubr.f32.gmra.mrb[54].mxu1 %v765_v17 }
 0x190   :  { %1868 = vpow2.f32 %v678_v3  ;;  %v769_v5 = vsel %vm529_vm7, %v2270_v9, %v1329_v6 }
 0x191   :  { %v1859_v50 = vpop.eup %1858  ;;  %952 = vmatprep.mubr.f32.mxu1 %v769_v5  ;;  %v768_v10 = vsel %vm528_vm10, %v2261_v57, %v1328_v41 }
 0x192   :  { %v1861_v53 = vpop.eup %1860  ;;  %v1332_v21 = vadd.f32 -1.0, %v1859_v50 }
 0x193   :  { %v1331_v28 = vadd.f32 -1.0, %v1861_v53  ;;  %953 = vmatmul.mubr.f32.gmra.mrb[56].mxu1 %v768_v10 }
 0x194   :  { %v772_v61 = vsel %vm532_vm9, %v2283_v12, %v1332_v21 }
 0x195   :  { %v1863_v22 = vpop.eup %1862  ;;  %957 = vmatprep.mubr.f32.mxu1 %v772_v61  ;;  %v771_v25 = vsel %vm531_vm12, %v2276_v11, %v1331_v28 }
 0x196   :  { %v1335_v31 = vadd.f32 -1.0, %v1863_v22  ;;  %v1865_v9 = vpop.eup %1864 }
 0x197   :  { %v1334_v49 = vadd.f32 -1.0, %v1865_v9  ;;  %958 = vmatmul.mubr.f32.gmra.mrb[58].mxu1 %v771_v25 }
 0x198   :  { %v775_v47 = vsel %vm535_vm11, %v2302_v33, %v1335_v31 }
 0x199   :  { %v1867_v37 = vpop.eup %1866  ;;  %962 = vmatprep.mubr.f32.mxu1 %v775_v47  ;;  %v774_v12 = vsel %vm534_vm14, %v2293_v52, %v1334_v49 }
 0x19a   :  { %v1338_v14 = vadd.f32 -1.0, %v1867_v37  ;;  %v1869_v15 = vpop.eup %1868 }
 0x19b   :  { %v1337_v26 = vadd.f32 -1.0, %v1869_v15  ;;  %963 = vmatmul.mubr.f32.gmra.mrb[60].mxu1 %v774_v12 }
 0x19c   :  { %v778_v57 = vsel %vm538_vm13, %v344_v51, %v1338_v14 }
 0x19d   :  { %967 = vmatprep.mubr.f32.mxu1 %v778_v57  ;;  %v777_v16 = vsel %vm537_vm15, %v2308_v39, %v1337_v26 }
 0x19f   :  { %968 = vmatmul.mubr.f32.gmra.mrb[62].mxu1 %v777_v16 }
 0x21f   :  { %v1583_v11 = vpop.f32.mrb[32].mxu0 }
 0x220   :  { %v1039_v18 = vpop.f32.mrb[33].mxu0 }
 0x227   :  { %v1586_v19 = vpop.f32.mrb[34].mxu0 }
 0x228   :  { %v1049_v20 = vpop.f32.mrb[35].mxu0 }
 0x22f   :  { %v1589_v24 = vpop.f32.mrb[36].mxu0 }
 0x230   :  { %v1059_v60 = vpop.f32.mrb[37].mxu0 }
 0x235   :  { %v1469_v27 = vpop.f32.mrb[32].mxu1 }
 0x236   :  { %v1470_v35 = vpop.f32.mrb[33].mxu1 }
 0x237   :  { %v1471_v29 = vadd.f32 %v1470_v35, %v1469_v27 }
 0x239   :  { %v1040_v30 = vadd.f32 %v1471_v29, %v1039_v18  ;;  %v1472_v46 = vpop.f32.mrb[34].mxu1 }
 0x23a   :  { %v1473_v33 = vpop.f32.mrb[35].mxu1 }
 0x23b   :  { %v1134_v52 = vmin.f32 %v1040_v30, 0.0  ;;  %v1474_v2 = vadd.f32 %v1473_v33, %v1472_v46  ;;  %vm1118_vm0 = vcmp.gt.f32.partialorder %v1040_v30, 0.0 }
 0x23d   :  { %v1150_v34 = vmul.f32 1.442695, %v1134_v52  ;;  %v1045_v36 = vadd.f32 %v1583_v11, %v1474_v2  ;;  %v1475_v40 = vpop.f32.mrb[36].mxu1  ;;  %v2339_v39 = vpop.f32.mrb[38].mxu0 }
 0x23e   :  { %v1476_v38 = vpop.f32.mrb[37].mxu1  ;;  %v1069_v7 = vpop.f32.mrb[39].mxu0 }
 0x23f   :  { %1870 = vpow2.f32 %v1150_v34  ;;  %v1135_v63 = vmin.f32 %v1045_v36, 0.0  ;;  %v1477_v8 = vadd.f32 %v1476_v38, %v1475_v40  ;;  %vm1119_vm1 = vcmp.gt.f32.partialorder %v1045_v36, 0.0 }
 0x241   :  { %v1152_v45 = vmul.f32 1.442695, %v1135_v63  ;;  %v1050_v43 = vadd.f32 %v1477_v8, %v1049_v20  ;;  %v1478_v42 = vpop.f32.mrb[38].mxu1 }
 0x242   :  { %v1479_v48 = vpop.f32.mrb[39].mxu1 }
 0x243   :  { %1872 = vpow2.f32 %v1152_v45  ;;  %v1136_v51 = vmin.f32 %v1050_v43, 0.0  ;;  %v1480_v44 = vadd.f32 %v1479_v48, %v1478_v42  ;;  %vm1120_vm2 = vcmp.gt.f32.partialorder %v1050_v43, 0.0 }
 0x245   :  { %v1154_v54 = vmul.f32 1.442695, %v1136_v51  ;;  %v1055_v55 = vadd.f32 %v1586_v19, %v1480_v44  ;;  %v1481_v56 = vpop.f32.mrb[40].mxu1 }
 0x246   :  { %v1482_v13 = vpop.f32.mrb[41].mxu1 }
 0x247   :  { %1874 = vpow2.f32 %v1154_v54  ;;  %v1137_v3 = vmin.f32 %v1055_v55, 0.0  ;;  %v1483_v58 = vadd.f32 %v1482_v13, %v1481_v56  ;;  %vm1121_vm3 = vcmp.gt.f32.partialorder %v1055_v55, 0.0 }
 0x248   :  { %v2346_v0 = vpop.f32.mrb[40].mxu0 }
 0x249   :  { %v1871_v23 = vpop.eup %1870  ;;  %v1156_v59 = vmul.f32 1.442695, %v1137_v3  ;;  %v1060_v62 = vadd.f32 %v1483_v58, %v1059_v60  ;;  %v1484_v6 = vpop.f32.mrb[42].mxu1 }
 0x24a   :  { %v1340_v4 = vadd.f32 -1.0, %v1871_v23  ;;  %v1079_v5 = vpop.f32.mrb[41].mxu0  ;;  %v1485_v17 = vpop.f32.mrb[43].mxu1 }
 0x24b   :  { %1876 = vpow2.f32 %v1156_v59  ;;  %v1138_v1 = vmin.f32 %v1060_v62, 0.0  ;;  %v1486_v22 = vadd.f32 %v1485_v17, %v1484_v6  ;;  %vm1122_vm4 = vcmp.gt.f32.partialorder %v1060_v62, 0.0 }
 0x24c   :  { %v1198_v50 = vsel %vm1118_vm0, %v1040_v30, %v1340_v4  ;;  %vm1269_vm0 = vcmask 7168  }
 0x24d   :  { %v1221_v41 = vmul.f32 %v2344_v32, %v1198_v50  ;;  %v1873_v53 = vpop.eup %1872  ;;  %v1158_v21 = vmul.f32 1.442695, %v1138_v1  ;;  %v1065_v10 = vadd.f32 %v1589_v24, %v1486_v22  ;;  %v1487_v28 = vpop.f32.mrb[44].mxu1 }
 0x24e   :  { %v1341_v61 = vadd.f32 -1.0, %v1873_v53  ;;  %v1488_v31 = vpop.f32.mrb[45].mxu1 }
 0x24f   :  { %1237 = vadd.xlane.f32.xlu0 %v1221_v41  ;;  %1878 = vpow2.f32 %v1158_v21  ;;  %v1139_v47 = vmin.f32 %v1065_v10, 0.0  ;;  %v1489_v25 = vadd.f32 %v1488_v31, %v1487_v28  ;;  %v2350_v14 = vpop.f32.mrb[42].mxu0  ;;  %vm1123_vm5 = vcmp.gt.f32.partialorder %v1065_v10, 0.0 }
 0x250   :  { %v1199_v9 = vsel %vm1119_vm1, %v1045_v36, %v1341_v61  ;;  %v1089_v26 = vpop.f32.mrb[43].mxu0 }
 0x251   :  { %v1875_v37 = vpop.eup %1874  ;;  %v1222_v49 = vmul.f32 %v2344_v32, %v1199_v9  ;;  %v1160_v57 = vmul.f32 1.442695, %v1139_v47  ;;  %v2352_v12 = vadd.f32 %v1489_v25, %v1069_v7 }
 0x252   :  { %v1342_v15 = vadd.f32 -1.0, %v1875_v37  ;;  %v1490_v19 = vpop.f32.mrb[46].mxu1 }
 0x253   :  { %1239 = vadd.xlane.f32.xlu0 %v1222_v49  ;;  %1880 = vpow2.f32 %v1160_v57  ;;  %v1140_v18 = vmin.f32 %v2352_v12, 0.0  ;;  %v1491_v24 = vpop.f32.mrb[47].mxu1  ;;  %vm1124_vm6 = vcmp.gt.f32.partialorder %v2352_v12, 0.0 }
 0x254   :  { %v1200_v16 = vsel %vm1120_vm2, %v1050_v43, %v1342_v15  ;;  %v1492_v35 = vadd.f32 %v1491_v24, %v1490_v19 }
 0x255   :  { %v1877_v11 = vpop.eup %1876  ;;  %v1223_v20 = vmul.f32 %v2344_v32, %v1200_v16  ;;  %v1162_v27 = vmul.f32 1.442695, %v1140_v18 }
 0x256   :  { %v1343_v60 = vadd.f32 -1.0, %v1877_v11  ;;  %v1075_v46 = vadd.f32 %v2339_v39, %v1492_v35  ;;  %v1493_v52 = vpop.f32.mrb[48].mxu1  ;;  %v2358_v34 = vpop.f32.mrb[44].mxu0 }
 0x257   :  { %1241 = vadd.xlane.f32.xlu1 %v1223_v20  ;;  %1882 = vpow2.f32 %v1162_v27  ;;  %v1494_v2 = vpop.f32.mrb[49].mxu1  ;;  %v1099_v63 = vpop.f32.mrb[45].mxu0 }
 0x258   :  { %v1201_v29 = vsel %vm1121_vm3, %v1055_v55, %v1343_v60  ;;  %v1141_v40 = vmin.f32 %v1075_v46, 0.0  ;;  %v1495_v38 = vadd.f32 %v1494_v2, %v1493_v52  ;;  %vm1125_vm7 = vcmp.gt.f32.partialorder %v1075_v46, 0.0 }
 0x259   :  { %v1879_v30 = vpop.eup %1878  ;;  %v1224_v33 = vmul.f32 %v2344_v32, %v1201_v29 }
 0x25a   :  { %v1344_v36 = vadd.f32 -1.0, %v1879_v30  ;;  %v1164_v7 = vmul.f32 1.442695, %v1141_v40  ;;  %v1080_v45 = vadd.f32 %v1495_v38, %v1079_v5  ;;  %v1496_v43 = vpop.f32.mrb[50].mxu1 }
 0x25b   :  { %1243 = vadd.xlane.f32.xlu1 %v1224_v33  ;;  %v1497_v48 = vpop.f32.mrb[51].mxu1 }
 0x25c   :  { %v1202_v8 = vsel %vm1122_vm4, %v1060_v62, %v1344_v36  ;;  %1884 = vpow2.f32 %v1164_v7  ;;  %v1142_v51 = vmin.f32 %v1080_v45, 0.0  ;;  %v1498_v44 = vadd.f32 %v1497_v48, %v1496_v43 }
 0x25d   :  { %v1225_v42 = vmul.f32 %v2344_v32, %v1202_v8  ;;  %v1881_v39 = vpop.eup %1880  ;;  %vm1126_vm8 = vcmp.gt.f32.partialorder %v1080_v45, 0.0 }
 0x25e   :  { %v1345_v54 = vadd.f32 -1.0, %v1881_v39  ;;  %v1166_v55 = vmul.f32 1.442695, %v1142_v51  ;;  %v1085_v56 = vadd.f32 %v2346_v0, %v1498_v44  ;;  %v1499_v13 = vpop.f32.mrb[52].mxu1 }
 0x25f   :  { %1245 = vadd.xlane.f32.xlu0 %v1225_v42  ;;  %v1500_v3 = vpop.f32.mrb[53].mxu1 }
 0x260   :  { %v1203_v23 = vsel %vm1123_vm5, %v1065_v10, %v1345_v54  ;;  %1886 = vpow2.f32 %v1166_v55  ;;  %v1143_v62 = vmin.f32 %v1085_v56, 0.0  ;;  %v1501_v4 = vadd.f32 %v1500_v3, %v1499_v13 }
 0x261   :  { %v2362_v58 = vpop.f32.mrb[46].mxu0  ;;  %v1883_v59 = vpop.eup %1882  ;;  %v1226_v6 = vmul.f32 %v2344_v32, %v1203_v23  ;;  %vm1127_vm9 = vcmp.gt.f32.partialorder %v1085_v56, 0.0 }
 0x262   :  { %v1109_v1 = vpop.f32.mrb[47].mxu0  ;;  %v1346_v5 = vadd.f32 -1.0, %v1883_v59  ;;  %v1168_v50 = vmul.f32 1.442695, %v1143_v62  ;;  %v1090_v17 = vadd.f32 %v1501_v4, %v1089_v26  ;;  %v1502_v41 = vpop.f32.mrb[54].mxu1 }
 0x263   :  { %1247 = vadd.xlane.f32.xlu1 %v1226_v6  ;;  %v1503_v0 = vpop.f32.mrb[55].mxu1 }
 0x264   :  { %v1204_v53 = vsel %vm1124_vm6, %v2352_v12, %v1346_v5  ;;  %1888 = vpow2.f32 %v1168_v50  ;;  %v1144_v21 = vmin.f32 %v1090_v17, 0.0  ;;  %v1504_v22 = vadd.f32 %v1503_v0, %v1502_v41 }
 0x265   :  { %v1227_v61 = vmul.f32 %v2344_v32, %v1204_v53  ;;  %vm1128_vm10 = vcmp.gt.f32.partialorder %v1090_v17, 0.0 }
 0x266   :  { %v1885_v10 = vpop.eup %1884  ;;  %v1170_v28 = vmul.f32 1.442695, %v1144_v21  ;;  %v1095_v31 = vadd.f32 %v2350_v14, %v1504_v22  ;;  %v1505_v9 = vpop.f32.mrb[56].mxu1 }
 0x267   :  { %1249 = vadd.xlane.f32.xlu0 %v1227_v61  ;;  %v1506_v37 = vpop.f32.mrb[57].mxu1  ;;  %v1347_v47 = vadd.f32 -1.0, %v1885_v10 }
 0x268   :  { %1890 = vpow2.f32 %v1170_v28  ;;  %v1145_v25 = vmin.f32 %v1095_v31, 0.0  ;;  %v1507_v49 = vadd.f32 %v1506_v37, %v1505_v9  ;;  %vm1129_vm11 = vcmp.gt.f32.partialorder %v1095_v31, 0.0 }
 0x269   :  { %v1205_v15 = vsel %vm1125_vm7, %v1075_v46, %v1347_v47 }
 0x26a   :  { %v1887_v57 = vpop.eup %1886  ;;  %v1172_v12 = vmul.f32 1.442695, %v1145_v25  ;;  %v1100_v26 = vadd.f32 %v1507_v49, %v1099_v63  ;;  %v1508_v16 = vpop.f32.mrb[58].mxu1  ;;  %v1228_v11 = vmul.f32 %v2344_v32, %v1205_v15 }
 0x26b   :  { %v1509_v18 = vpop.f32.mrb[59].mxu1  ;;  %v1348_v19 = vadd.f32 -1.0, %v1887_v57 }
 0x26c   :  { %1892 = vpow2.f32 %v1172_v12  ;;  %v1146_v20 = vmin.f32 %v1100_v26, 0.0  ;;  %v1510_v14 = vadd.f32 %v1509_v18, %v1508_v16  ;;  %1251 = vadd.xlane.f32.xlu1 %v1228_v11  ;;  %vm1130_vm12 = vcmp.gt.f32.partialorder %v1100_v26, 0.0 }
 0x26d   :  { %v1206_v24 = vsel %vm1126_vm8, %v1080_v45, %v1348_v19 }
 0x26e   :  { %v1889_v60 = vpop.eup %1888  ;;  %v1174_v27 = vmul.f32 1.442695, %v1146_v20  ;;  %v1105_v35 = vadd.f32 %v2358_v34, %v1510_v14  ;;  %v1511_v29 = vpop.f32.mrb[60].mxu1  ;;  %v1229_v30 = vmul.f32 %v2344_v32, %v1206_v24 }
 0x26f   :  { %v1512_v46 = vpop.f32.mrb[61].mxu1  ;;  %v1349_v52 = vadd.f32 -1.0, %v1889_v60 }
 0x270   :  { %1894 = vpow2.f32 %v1174_v27  ;;  %v1147_v33 = vmin.f32 %v1105_v35, 0.0  ;;  %v1513_v2 = vadd.f32 %v1512_v46, %v1511_v29  ;;  %1253 = vadd.xlane.f32.xlu0 %v1229_v30  ;;  %vm1131_vm13 = vcmp.gt.f32.partialorder %v1105_v35, 0.0 }
 0x271   :  { %v1207_v36 = vsel %vm1127_vm9, %v1085_v56, %v1349_v52 }
 0x272   :  { %v1891_v40 = vpop.eup %1890  ;;  %v1176_v38 = vmul.f32 1.442695, %v1147_v33  ;;  %v1110_v63 = vadd.f32 %v1513_v2, %v1109_v1  ;;  %v1514_v8 = vpop.f32.mrb[62].mxu1  ;;  %v1230_v7 = vmul.f32 %v2344_v32, %v1207_v36 }
 0x273   :  { %v1515_v45 = vpop.f32.mrb[63].mxu1  ;;  %v1350_v43 = vadd.f32 -1.0, %v1891_v40 }
 0x274   :  { %1896 = vpow2.f32 %v1176_v38  ;;  %v1148_v34 = vmin.f32 %v1110_v63, 0.0  ;;  %v1516_v42 = vadd.f32 %v1515_v45, %v1514_v8  ;;  %1255 = vadd.xlane.f32.xlu1 %v1230_v7  ;;  %vm1132_vm14 = vcmp.gt.f32.partialorder %v1110_v63, 0.0 }
 0x275   :  { %v1208_v48 = vsel %vm1128_vm10, %v1090_v17, %v1350_v43 }
 0x276   :  { %v1893_v39 = vpop.eup %1892  ;;  %v1178_v51 = vmul.f32 1.442695, %v1148_v34  ;;  %v1115_v44 = vadd.f32 %v2362_v58, %v1516_v42  ;;  %v1231_v54 = vmul.f32 %v2344_v32, %v1208_v48 }
 0x277   :  { %v1351_v55 = vadd.f32 -1.0, %v1893_v39 }
 0x278   :  { %1898 = vpow2.f32 %v1178_v51  ;;  %v1149_v56 = vmin.f32 %v1115_v44, 0.0  ;;  %1257 = vadd.xlane.f32.xlu0 %v1231_v54  ;;  %vm1133_vm15 = vcmp.gt.f32.partialorder %v1115_v44, 0.0 }
 0x279   :  { %v1209_v13 = vsel %vm1129_vm11, %v1095_v31, %v1351_v55 }
 0x27a   :  { %v1895_v3 = vpop.eup %1894  ;;  %v1180_v23 = vmul.f32 1.442695, %v1149_v56  ;;  %v1232_v59 = vmul.f32 %v2344_v32, %v1209_v13 }
 0x27b   :  { %v1352_v62 = vadd.f32 -1.0, %v1895_v3 }
 0x27c   :  { %1900 = vpow2.f32 %v1180_v23  ;;  %1259 = vadd.xlane.f32.xlu1 %v1232_v59 }
 0x27d   :  { %v1210_v4 = vsel %vm1130_vm12, %v1100_v26, %v1352_v62 }
 0x27e   :  { %v1897_v1 = vpop.eup %1896  ;;  %v1233_v58 = vmul.f32 %v2344_v32, %v1210_v4 }
 0x27f   :  { %v1353_v6 = vadd.f32 -1.0, %v1897_v1 }
 0x280   :  { %1261 = vadd.xlane.f32.xlu0 %v1233_v58 }
 0x281   :  { %v1211_v5 = vsel %vm1131_vm13, %v1105_v35, %v1353_v6 }
 0x282   :  { %v1899_v50 = vpop.eup %1898  ;;  %v1234_v17 = vmul.f32 %v2344_v32, %v1211_v5 }
 0x283   :  { %v1354_v41 = vadd.f32 -1.0, %v1899_v50 }
 0x284   :  { %1263 = vadd.xlane.f32.xlu1 %v1234_v17 }
 0x285   :  { %v1212_v0 = vsel %vm1132_vm14, %v1110_v63, %v1354_v41 }
 0x286   :  { %v1901_v53 = vpop.eup %1900  ;;  %v1235_v21 = vmul.f32 %v2344_v32, %v1212_v0 }
 0x287   :  { %v1355_v22 = vadd.f32 -1.0, %v1901_v53 }
 0x288   :  { %1265 = vadd.xlane.f32.xlu0 %v1235_v21 }
 0x289   :  { %v1213_v61 = vsel %vm1133_vm15, %v1115_v44, %v1355_v22 }
 0x28a   :  { %v1236_v10 = vmul.f32 %v2344_v32, %v1213_v61 }
 0x28c   :  { %1267 = vadd.xlane.f32.xlu1 %v1236_v10 }
 0x2dc   :  { %v1238_v28 = vpop.xlane.xlu0 %1237 }
 0x2dd   :  { %1270 = vst.msk [vmem:[%s2448_s4] sm:$0xff] %vm1269_vm0, %v1238_v28 }
 0x2e0   :  { %v1240_v31 = vpop.xlane.xlu0 %1239 }
 0x2e1   :  { %1271 = vst.msk [vmem:[%s2448_s4 + $0x8] sm:$0xff] %vm1269_vm0, %v1240_v31 }
 0x2e4   :  { %v1242_v9 = vpop.xlane.xlu1 %1241 }
 0x2e5   :  { %1272 = vst.msk [vmem:[%s2448_s4 + $0x10] sm:$0xff] %vm1269_vm0, %v1242_v9 }
 0x2e8   :  { %v1244_v32 = vpop.xlane.xlu1 %1243 }
 0x2e9   :  { %1273 = vst.msk [vmem:[%s2448_s4 + $0x18] sm:$0xff] %vm1269_vm0, %v1244_v32 }
 0x2ec   :  { %v1246_v37 = vpop.xlane.xlu0 %1245 }
 0x2ed   :  { %1274 = vst.msk [vmem:[%s2448_s4 + $0x20] sm:$0xff] %vm1269_vm0, %v1246_v37 }
 0x2f0   :  { %v1248_v47 = vpop.xlane.xlu1 %1247 }
 0x2f1   :  { %1275 = vst.msk [vmem:[%s2448_s4 + $0x28] sm:$0xff] %vm1269_vm0, %v1248_v47 }
 0x2f4   :  { %v1250_v25 = vpop.xlane.xlu0 %1249 }
 0x2f5   :  { %1276 = vst.msk [vmem:[%s2448_s4 + $0x30] sm:$0xff] %vm1269_vm0, %v1250_v25 }
 0x2f9   :  { %v1252_v49 = vpop.xlane.xlu1 %1251 }
 0x2fa   :  { %1277 = vst.msk [vmem:[%s2448_s4 + $0x38] sm:$0xff] %vm1269_vm0, %v1252_v49 }
 0x2fd   :  { %v1254_v15 = vpop.xlane.xlu0 %1253 }
 0x2fe   :  { %1278 = vst.msk [vmem:[%s2448_s4 + $0x40] sm:$0xff] %vm1269_vm0, %v1254_v15 }
 0x301   :  { %v1256_v57 = vpop.xlane.xlu1 %1255 }
 0x302   :  { %1279 = vst.msk [vmem:[%s2448_s4 + $0x48] sm:$0xff] %vm1269_vm0, %v1256_v57 }
 0x305   :  { %v1258_v12 = vpop.xlane.xlu0 %1257 }
 0x306   :  { %1280 = vst.msk [vmem:[%s2448_s4 + $0x50] sm:$0xff] %vm1269_vm0, %v1258_v12 }
 0x309   :  { %v1260_v26 = vpop.xlane.xlu1 %1259 }
 0x30a   :  { %1281 = vst.msk [vmem:[%s2448_s4 + $0x58] sm:$0xff] %vm1269_vm0, %v1260_v26 }
 0x30d   :  { %v1262_v16 = vpop.xlane.xlu0 %1261 }
 0x30e   :  { %1282 = vst.msk [vmem:[%s2448_s4 + $0x60] sm:$0xff] %vm1269_vm0, %v1262_v16 }
 0x311   :  { %v1264_v11 = vpop.xlane.xlu1 %1263 }
 0x312   :  { %1283 = vst.msk [vmem:[%s2448_s4 + $0x68] sm:$0xff] %vm1269_vm0, %v1264_v11 }
 0x315   :  { %v1266_v18 = vpop.xlane.xlu0 %1265 }
 0x316   :  { %1284 = vst.msk [vmem:[%s2448_s4 + $0x70] sm:$0xff] %vm1269_vm0, %v1266_v18 }
 0x319   :  { %v1268_v19 = vpop.xlane.xlu1 %1267 }
 0x31a   :  { %1285 = vst.msk [vmem:[%s2448_s4 + $0x78] sm:$0xff] %vm1269_vm0, %v1268_v19 }
 0x31b   :  { %1290 = vsyncpa [#allocation3], 1 }
 0x31c   :  { %1291 = vsyncpa [#allocation5], 1 }

</bundles_post_ra>
